<compile_context>
chip_gen: v7x
topology: tpu7x:2x2x1
jax: 0.10.0
libtpu: 0.0.40
codegen_flags: <defaults>
</compile_context>

<pallas_src>
import functools
import math

import jax
import jax.numpy as jnp
import numpy as np
from jax.experimental import pallas as pl
from jax.experimental.pallas import tpu as pltpu


def _round_up(v, m):
    return (v + m - 1) // m * m


def _bsconv_kernel(xa_ref, xc_ref, xb_ref, w1_ref, b1_ref, w2_ref, b2_ref,
                   o_ref, ypad_ref, *, H, W, TH, K, n_h, tail_rows):
    # xa_ref  : (1, p,  Wb, Cin_p)  p rows just above this strip (clamped at image top)
    # xc_ref  : (1, TH, Wb, Cin_p)  the strip's own rows
    # xb_ref  : (1, p,  Wb, Cin_p)  p rows just below this strip (clamped at image bottom)
    # w1_ref  : (Cin_p, TCo)        pointwise weights (matmul dtype)   b1_ref: (1, TCo) f32
    # w2_ref  : (K*K, TCo)          depthwise taps f32                 b2_ref: (1, TCo) f32
    # o_ref   : (1, TH, Wb, TCo)    f32
    # ypad_ref: (TH + 2p, Wb + 2p, TCo) f32 scratch for column-shifted tap reads
    p = (K - 1) // 2
    R = TH + 2 * p
    Wb = o_ref.shape[2]
    TCo = o_ref.shape[3]
    h_idx = pl.program_id(1)

    w1 = w1_ref[...]                                         # (Cin_p, TCo)

    # Pointwise bias with the W-alignment padding columns pre-zeroed: the padded
    # x columns are zero, so a masked bias makes y exactly zero there and no
    # per-element column select is needed afterwards. Static skip when Wb == W.
    if Wb > W:
        col = jax.lax.broadcasted_iota(jnp.int32, (Wb, TCo), 0)
        bias1 = jnp.where(col < W, b1_ref[...], 0.0)         # (Wb, TCo)
    else:
        bias1 = b1_ref[...]                                  # (1, TCo), broadcasts

    def pointwise(x_piece, nrows):
        # 1x1 conv == channel matmul on the MXU (bf16 operands, f32 accumulation).
        y = jnp.dot(x_piece.reshape(nrows * Wb, x_piece.shape[-1]), w1,
                    preferred_element_type=jnp.float32)
        return y.reshape(nrows, Wb, TCo) + bias1

    # ---- rows just above the strip (image rows h*TH-p .. h*TH-1) ----
    ya = pointwise(xa_ref[0], p)
    ra = h_idx * TH - p + jax.lax.broadcasted_iota(jnp.int32, (p, TCo), 0)
    ya = jnp.where(((ra >= 0) & (ra < H))[:, None, :], ya, 0.0)   # zero above the image
    ypad_ref[0:p, p:p + Wb, :] = ya

    # ---- the strip's own rows (image rows h*TH .. h*TH+TH-1) ----
    ypad_ref[p:p + TH, p:p + Wb, :] = pointwise(xc_ref[0], TH)

    # ---- rows just below the strip ----
    yb = pointwise(xb_ref[0], p)
    rb = (h_idx + 1) * TH + jax.lax.broadcasted_iota(jnp.int32, (p, TCo), 0)
    yb = jnp.where((rb < H)[:, None, :], yb, 0.0)                 # zero below the image
    ypad_ref[p + TH:R, p:p + Wb, :] = yb

    # Only the last strip can own rows >= H (H_p = ceil(H/TH)*TH): zero them with
    # a static-sized store instead of a full-tile select on every strip.
    if tail_rows > 0:
        @pl.when(h_idx == n_h - 1)
        def _():
            ypad_ref[p + TH - tail_rows:p + TH, p:p + Wb, :] = jnp.zeros(
                (tail_rows, Wb, TCo), jnp.float32)

    # Left/right column halos of the scratch = Conv2d zero padding. Re-zeroed
    # every step (a first-iteration-only init is unsafe under megacore grid
    # splitting, where each core owns its own scratch); cost is negligible.
    ypad_ref[:, 0:p, :] = jnp.zeros((R, p, TCo), jnp.float32)
    ypad_ref[:, p + Wb:p + Wb + p, :] = jnp.zeros((R, p, TCo), jnp.float32)

    # ---- depthwise KxK conv (stride 1) on the VPU ----
    # K column-shifted reads of the scratch; the K row shifts per column shift
    # are free leading-dim slices of the loaded value (K reads, not K*K).
    # (A pltpu.roll/XLU-based column shift could drop the scratch entirely; the
    #  scratch path is kept as the known-good lowering.)
    acc = None
    for kw in range(K):
        y_kw = ypad_ref[:, kw:kw + Wb, :]                    # (R, Wb, TCo)
        for kh in range(K):
            t = y_kw[kh:kh + TH] * w2_ref[kh * K + kw, :]
            acc = t if acc is None else acc + t
    o_ref[0] = (acc + b2_ref[...]).astype(o_ref.dtype)


def bsconv2d_nhwc(x_nhwc, w1, b1, w2, b2, *, kernel_size=3, block_h=None,
                  block_cout=None, matmul_dtype=jnp.bfloat16,
                  vmem_limit_bytes=None):
    """Fused BSConv2d forward on an NHWC input; returns NHWC float32.

    x_nhwc: (N, H, W, Cin)
    w1: (Cout, Cin)  pointwise weights ; b1: (Cout,)
    w2: (Cout, K, K) depthwise weights ; b2: (Cout,)
    """
    # TODO(synk): stride != 1, dilation != 1 and even kernel_size variants of the
    # module are not implemented (module defaults: stride=1, dilation=1, K=3).
    N, H, W, Cin = x_nhwc.shape
    Cout = w1.shape[0]
    K = int(kernel_size)
    assert K % 2 == 1 and K >= 3, "only odd kernel_size >= 3 is supported"
    p = (K - 1) // 2

    # lane-dense channels, sublane-friendly width
    Cin_p = _round_up(Cin, 128)
    Cout_p = _round_up(Cout, 128)
    if block_cout is None:
        # 256-wide Cout tiles fill the v6e/v7x 2x256^2 MXU when the pointwise is
        # big enough to matter; 128 otherwise (also the v5e-native MXU width).
        block_cout = 256 if (Cout_p % 256 == 0 and Cin_p >= 256) else 128
    TCo = min(int(block_cout), Cout_p)
    assert TCo % 128 == 0 and Cout_p % TCo == 0
    W_p = _round_up(W, 8)
    in_bytes = jnp.dtype(matmul_dtype).itemsize

    # ---- generation-aware VMEM budget (v7x: 64 MiB/TC; v5e/v6e: 128 MiB) ----
    if vmem_limit_bytes is None:
        try:
            cap = int(pltpu.get_tpu_info().vmem_capacity_bytes)
        except Exception:
            cap = 64 * 1024 * 1024            # conservative fallback
        vmem_limit_bytes = max(32 * 1024 * 1024,
                               min(cap * 3 // 4, 100 * 1024 * 1024))
    vmem_limit_bytes = int(vmem_limit_bytes)

    # ---- row-strip height from the real per-step working set ----
    step = math.lcm(8, p)
    if block_h is None:
        budget = int(vmem_limit_bytes * 0.6)
        per_row = (2 * W_p * Cin_p * in_bytes          # strip input, double-buffered
                   + 2 * W_p * TCo * 4                 # output, double-buffered
                   + (W_p + 2 * p) * TCo * 4)          # ypad scratch row
        const = (4 * p * W_p * Cin_p * in_bytes        # top+bottom halos, double-buffered
                 + 2 * p * (W_p + 2 * p) * TCo * 4     # ypad halo rows
                 + 2 * Cin_p * TCo * in_bytes          # w1 tile, double-buffered
                 + 4 * (K * K + 2) * TCo * 4)          # w2 / b1 / b2 tiles (generous)
        block_h = max(step, (budget - const) // per_row // step * step)
        block_h = min(block_h, _round_up(H, step), 128 // step * step)
    TH = int(block_h)
    assert TH % p == 0, "block_h must be a multiple of (kernel_size - 1) // 2"

    H_p = _round_up(H, TH)
    n_h = H_p // TH
    n_co = Cout_p // TCo
    r = TH // p              # p-row halo blocks per strip
    n_hblk = H_p // p        # p-row blocks along the padded H
    tail_rows = H_p - H      # strip rows below the real image (last strip only)

    # ---- glue: cast + zero-pad to aligned sizes (bf16 halves input HBM bytes) ----
    x = x_nhwc.astype(matmul_dtype)
    x = jnp.pad(x, ((0, 0), (0, H_p - H), (0, W_p - W), (0, Cin_p - Cin)))

    w1_k = jnp.pad(jnp.transpose(w1, (1, 0)),
                   ((0, Cin_p - Cin), (0, Cout_p - Cout))).astype(matmul_dtype)
    b1_k = jnp.pad(b1.astype(jnp.float32), (0, Cout_p - Cout)).reshape(1, Cout_p)
    w2_k = jnp.pad(jnp.transpose(w2.reshape(Cout, K * K), (1, 0)).astype(jnp.float32),
                   ((0, 0), (0, Cout_p - Cout)))                    # (K*K, Cout_p)
    b2_k = jnp.pad(b2.astype(jnp.float32), (0, Cout_p - Cout)).reshape(1, Cout_p)

    kernel = functools.partial(_bsconv_kernel, H=H, W=W, TH=TH, K=K,
                               n_h=n_h, tail_rows=tail_rows)

    out_nhwc = pl.pallas_call(
        kernel,
        out_shape=jax.ShapeDtypeStruct((N, H_p, W_p, Cout_p), jnp.float32),
        grid_spec=pltpu.PrefetchScalarGridSpec(
            num_scalar_prefetch=0,
            # Cout tiles innermost: the x-strip block indices do not depend on
            # `co`, so Pallas skips re-DMAing the big input strip across Cout
            # tiles and only the small weight tiles are re-fetched.
            grid=(N, n_h, n_co),
            in_specs=[
                # p rows just above the strip (blocked in p-row units, clamped at top)
                pl.BlockSpec((1, p, W_p, Cin_p),
                             lambda n, h, co: (n, jnp.maximum(h * r - 1, 0), 0, 0)),
                # the strip itself (blocked in TH-row units)
                pl.BlockSpec((1, TH, W_p, Cin_p),
                             lambda n, h, co: (n, h, 0, 0)),
                # p rows just below the strip (clamped at bottom)
                pl.BlockSpec((1, p, W_p, Cin_p),
                             lambda n, h, co: (n, jnp.minimum((h + 1) * r, n_hblk - 1), 0, 0)),
                pl.BlockSpec((Cin_p, TCo), lambda n, h, co: (0, co)),
                pl.BlockSpec((1, TCo), lambda n, h, co: (0, co)),
                pl.BlockSpec((K * K, TCo), lambda n, h, co: (0, co)),
                pl.BlockSpec((1, TCo), lambda n, h, co: (0, co)),
            ],
            out_specs=pl.BlockSpec((1, TH, W_p, TCo),
                                   lambda n, h, co: (n, h, 0, co)),
            scratch_shapes=[pltpu.VMEM((TH + 2 * p, W_p + 2 * p, TCo), jnp.float32)],
        ),
        compiler_params=pltpu.CompilerParams(
            dimension_semantics=("parallel", "parallel", "arbitrary"),
            vmem_limit_bytes=vmem_limit_bytes,
        ),
    )(x, x, x, w1_k, b1_k, w2_k, b2_k)

    return out_nhwc[:, :H, :W, :Cout]


def bsconv2d(x_nchw, w1, b1, w2, b2, **kwargs):
    """PyTorch-layout wrapper: (N, Cin, H, W) -> (N, Cout, H, W).

    Prefer bsconv2d_nhwc when the surrounding graph is already channels-last:
    the two layout transposes here are full HBM passes comparable to the
    kernel's own traffic."""
    out = bsconv2d_nhwc(jnp.transpose(x_nchw, (0, 2, 3, 1)), w1, b1, w2, b2, **kwargs)
    return jnp.transpose(out, (0, 3, 1, 2))


def bsconv2d_reference(x_nchw, w1, b1, w2, b2, *, kernel_size=3):
    """Pure-JAX f32 reference matching PyTorch semantics."""
    N, Cin, H, W = x_nchw.shape
    Cout = w1.shape[0]
    K = kernel_size
    p = (K - 1) // 2
    x = jnp.transpose(x_nchw, (0, 2, 3, 1))                             # NHWC
    y = jnp.einsum("nhwc,oc->nhwo", x, w1,
                   preferred_element_type=jnp.float32) + b1             # pointwise
    pad = jnp.pad(y, ((0, 0), (p, p), (p, p), (0, 0)))
    out = jnp.zeros((N, H, W, Cout), jnp.float32)
    for kh in range(K):
        for kw in range(K):
            out = out + pad[:, kh:kh + H, kw:kw + W, :] * w2[:, kh, kw]
    out = out + b2
    return jnp.transpose(out, (0, 3, 1, 2))


if __name__ == "__main__":
    key = jax.random.PRNGKey(0)
    keys = jax.random.split(key, 10)

    # Case 1: module-like small shapes; block_h=8 -> two row strips per image,
    # exercising the halo-row exchange and the top/bottom zero padding.
    N, Cin, Cout, H, W, K = 2, 4, 8, 16, 16, 3
    x = jax.random.normal(keys[0], (N, Cin, H, W), jnp.float32)
    w1 = jax.random.normal(keys[1], (Cout, Cin), jnp.float32) * 0.1     # (Cout,Cin,1,1) squeezed
    b1 = jax.random.normal(keys[2], (Cout,), jnp.float32) * 0.1
    w2 = jax.random.normal(keys[3], (Cout, K, K), jnp.float32) * 0.1    # (Cout,1,K,K) squeezed
    b2 = jax.random.normal(keys[4], (Cout,), jnp.float32) * 0.1

    out = jax.block_until_ready(bsconv2d(x, w1, b1, w2, b2, kernel_size=K, block_h=8))
    ref = jax.block_until_ready(bsconv2d_reference(x, w1, b1, w2, b2, kernel_size=K))
    assert out.shape == (N, Cout, H, W), out.shape
    # bf16 MXU operands (f32 accumulation) -> compare against the f32 reference
    # with a correspondingly loosened tolerance.
    np.testing.assert_allclose(np.asarray(out), np.asarray(ref), rtol=2e-2, atol=2e-2)

    # Case 2: auto block_h; H not a multiple of the strip height and W not a
    # multiple of 8 (exercises the VMEM-budget TH heuristic, the masked-bias
    # column path and the last-strip tail zeroing), different channel counts.
    N2, Cin2, Cout2, H2, W2 = 1, 8, 16, 20, 10
    x2 = jax.random.normal(keys[5], (N2, Cin2, H2, W2), jnp.float32)
    w1_2 = jax.random.normal(keys[6], (Cout2, Cin2), jnp.float32) * 0.1
    b1_2 = jax.random.normal(keys[7], (Cout2,), jnp.float32) * 0.1
    w2_2 = jax.random.normal(keys[8], (Cout2, K, K), jnp.float32) * 0.1
    b2_2 = jax.random.normal(keys[9], (Cout2,), jnp.float32) * 0.1

    out2 = jax.block_until_ready(
        bsconv2d(x2, w1_2, b1_2, w2_2, b2_2, kernel_size=K))
    ref2 = jax.block_until_ready(
        bsconv2d_reference(x2, w1_2, b1_2, w2_2, b2_2, kernel_size=K))
    assert out2.shape == (N2, Cout2, H2, W2), out2.shape
    np.testing.assert_allclose(np.asarray(out2), np.asarray(ref2), rtol=2e-2, atol=2e-2)

    print("KERNEL_OK")
</pallas_src>

<mosaic_0001>
module attributes {stable_mosaic.version = 11 : i64} {
  func.func @_bsconv_kernel(%arg0: i32, %arg1: i32, %arg2: i32, %arg3: memref<1x1x16x128xbf16, #tpu.memory_space<vmem>>, %arg4: memref<1x8x16x128xbf16, #tpu.memory_space<vmem>>, %arg5: memref<1x1x16x128xbf16, #tpu.memory_space<vmem>>, %arg6: memref<128x128xbf16, #tpu.memory_space<vmem>>, %arg7: memref<1x128xf32, #tpu.memory_space<vmem>>, %arg8: memref<9x128xf32, #tpu.memory_space<vmem>>, %arg9: memref<1x128xf32, #tpu.memory_space<vmem>>, %arg10: memref<1x8x16x128xf32, #tpu.memory_space<vmem>>, %arg11: memref<10x18x128xf32, #tpu.memory_space<vmem>>) attributes {dimension_semantics = [#tpu.dimension_semantics<parallel>, #tpu.dimension_semantics<parallel>, #tpu.dimension_semantics<arbitrary>], iteration_bounds = array<i64: 2, 2, 1>, scalar_prefetch = 0 : i64, scratch_operands = 1 : i64, tpu.core_type = #tpu.core_type<tc>, window_params = [{transform_indices = @transform_0, window_bounds = array<i64: 1, 1, 16, 128>}, {transform_indices = @transform_1, window_bounds = array<i64: 1, 8, 16, 128>}, {transform_indices = @transform_2, window_bounds = array<i64: 1, 1, 16, 128>}, {transform_indices = @transform_3, window_bounds = array<i64: 128, 128>}, {transform_indices = @transform_4, window_bounds = array<i64: 1, 128>}, {transform_indices = @transform_5, window_bounds = array<i64: 9, 128>}, {transform_indices = @transform_6, window_bounds = array<i64: 1, 128>}, {transform_indices = @transform_7, window_bounds = array<i64: 1, 8, 16, 128>}]} {
    %c0 = arith.constant 0 : index
    %c0_0 = arith.constant 0 : index
    %0 = vector.load %arg6[%c0, %c0_0] : memref<128x128xbf16, #tpu.memory_space<vmem>>, vector<128x128xbf16>
    %c0_1 = arith.constant 0 : index
    %c0_2 = arith.constant 0 : index
    %1 = vector.load %arg7[%c0_1, %c0_2] : memref<1x128xf32, #tpu.memory_space<vmem>>, vector<1x128xf32>
    %c0_3 = arith.constant 0 : index
    %c0_4 = arith.constant 0 : index
    %c0_5 = arith.constant 0 : index
    %c0_6 = arith.constant 0 : index
    %2 = vector.load %arg3[%c0_3, %c0_4, %c0_5, %c0_6] : memref<1x1x16x128xbf16, #tpu.memory_space<vmem>>, vector<1x1x16x128xbf16>
    %3 = vector.shape_cast %2 : vector<1x1x16x128xbf16> to vector<1x16x128xbf16>
    %4 = vector.shape_cast %3 : vector<1x16x128xbf16> to vector<16x128xbf16>
    %cst = arith.constant dense<0.000000e+00> : vector<16x128xf32>
    %5 = tpu.matmul %4, %0, %cst {dimension_numbers = #tpu.dot_dimension_numbers<[1], [0], [0], [1], [0, 0, 1, 1], [], []>} : vector<16x128xbf16>, vector<128x128xbf16>, vector<16x128xf32> -> vector<16x128xf32>
    %6 = vector.shape_cast %5 : vector<16x128xf32> to vector<1x16x128xf32>
    %7 = vector.shape_cast %1 : vector<1x128xf32> to vector<1x1x128xf32>
    %8 = vector.broadcast %7 : vector<1x1x128xf32> to vector<1x16x128xf32>
    %9 = arith.addf %6, %8 : vector<1x16x128xf32>
    %c8_i32 = arith.constant 8 : i32
    %10 = arith.muli %arg1, %c8_i32 : i32
    %c1_i32 = arith.constant 1 : i32
    %11 = arith.subi %10, %c1_i32 : i32
    %12 = tpu.iota {dimensions = array<i32: 0>} : vector<1x128xi32>
    %13 = vector.broadcast %11 : i32 to vector<1x128xi32>
    %14 = arith.addi %13, %12 : vector<1x128xi32>
    %c0_i32 = arith.constant 0 : i32
    %15 = vector.broadcast %c0_i32 : i32 to vector<1x128xi32>
    %16 = arith.cmpi sge, %14, %15 : vector<1x128xi32>
    %c16_i32 = arith.constant 16 : i32
    %17 = vector.broadcast %c16_i32 : i32 to vector<1x128xi32>
    %18 = arith.cmpi slt, %14, %17 : vector<1x128xi32>
    %19 = arith.andi %16, %18 : vector<1x128xi1>
    %20 = vector.shape_cast %19 : vector<1x128xi1> to vector<1x1x128xi1>
    %cst_7 = arith.constant 0.000000e+00 : f32
    %21 = vector.shape_cast %20 : vector<1x1x128xi1> to vector<1x1x128xi1>
    %22 = vector.broadcast %21 : vector<1x1x128xi1> to vector<1x16x128xi1>
    %23 = vector.broadcast %cst_7 : f32 to vector<1x16x128xf32>
    %24 = arith.select %22, %9, %23 : vector<1x16x128xi1>, vector<1x16x128xf32>
    %c0_8 = arith.constant 0 : index
    %c1 = arith.constant 1 : index
    %c0_9 = arith.constant 0 : index
    %25 = vector.load %arg11[%c0_8, %c1, %c0_9] : memref<10x18x128xf32, #tpu.memory_space<vmem>>, vector<1x16x128xf32>
    tpu.vector_store %arg11[%c0_8, %c1, %c0_9], %24 {strides = array<i32>} : memref<10x18x128xf32, #tpu.memory_space<vmem>>, vector<1x16x128xf32>,
    %c0_10 = arith.constant 0 : index
    %c0_11 = arith.constant 0 : index
    %c0_12 = arith.constant 0 : index
    %c0_13 = arith.constant 0 : index
    %26 = vector.load %arg4[%c0_10, %c0_11, %c0_12, %c0_13] : memref<1x8x16x128xbf16, #tpu.memory_space<vmem>>, vector<1x8x16x128xbf16>
    %27 = vector.shape_cast %26 : vector<1x8x16x128xbf16> to vector<8x16x128xbf16>
    %28 = vector.shape_cast %27 : vector<8x16x128xbf16> to vector<128x128xbf16>
    %cst_14 = arith.constant dense<0.000000e+00> : vector<128x128xf32>
    %29 = tpu.matmul %28, %0, %cst_14 {dimension_numbers = #tpu.dot_dimension_numbers<[1], [0], [0], [1], [0, 0, 1, 1], [], []>} : vector<128x128xbf16>, vector<128x128xbf16>, vector<128x128xf32> -> vector<128x128xf32>
    %30 = vector.shape_cast %29 : vector<128x128xf32> to vector<8x16x128xf32>
    %31 = vector.shape_cast %1 : vector<1x128xf32> to vector<1x1x128xf32>
    %32 = vector.broadcast %31 : vector<1x1x128xf32> to vector<8x16x128xf32>
    %33 = arith.addf %30, %32 : vector<8x16x128xf32>
    %c1_15 = arith.constant 1 : index
    %c1_16 = arith.constant 1 : index
    %c0_17 = arith.constant 0 : index
    %34 = vector.load %arg11[%c1_15, %c1_16, %c0_17] : memref<10x18x128xf32, #tpu.memory_space<vmem>>, vector<8x16x128xf32>
    tpu.vector_store %arg11[%c1_15, %c1_16, %c0_17], %33 {strides = array<i32>} : memref<10x18x128xf32, #tpu.memory_space<vmem>>, vector<8x16x128xf32>,
    %c0_18 = arith.constant 0 : index
    %c0_19 = arith.constant 0 : index
    %c0_20 = arith.constant 0 : index
    %c0_21 = arith.constant 0 : index
    %35 = vector.load %arg5[%c0_18, %c0_19, %c0_20, %c0_21] : memref<1x1x16x128xbf16, #tpu.memory_space<vmem>>, vector<1x1x16x128xbf16>
    %36 = vector.shape_cast %35 : vector<1x1x16x128xbf16> to vector<1x16x128xbf16>
    %37 = vector.shape_cast %36 : vector<1x16x128xbf16> to vector<16x128xbf16>
    %cst_22 = arith.constant dense<0.000000e+00> : vector<16x128xf32>
    %38 = tpu.matmul %37, %0, %cst_22 {dimension_numbers = #tpu.dot_dimension_numbers<[1], [0], [0], [1], [0, 0, 1, 1], [], []>} : vector<16x128xbf16>, vector<128x128xbf16>, vector<16x128xf32> -> vector<16x128xf32>
    %39 = vector.shape_cast %38 : vector<16x128xf32> to vector<1x16x128xf32>
    %40 = vector.shape_cast %1 : vector<1x128xf32> to vector<1x1x128xf32>
    %41 = vector.broadcast %40 : vector<1x1x128xf32> to vector<1x16x128xf32>
    %42 = arith.addf %39, %41 : vector<1x16x128xf32>
    %c1_i32_23 = arith.constant 1 : i32
    %43 = arith.addi %arg1, %c1_i32_23 : i32
    %c8_i32_24 = arith.constant 8 : i32
    %44 = arith.muli %43, %c8_i32_24 : i32
    %45 = tpu.iota {dimensions = array<i32: 0>} : vector<1x128xi32>
    %46 = vector.broadcast %44 : i32 to vector<1x128xi32>
    %47 = arith.addi %46, %45 : vector<1x128xi32>
    %c16_i32_25 = arith.constant 16 : i32
    %48 = vector.broadcast %c16_i32_25 : i32 to vector<1x128xi32>
    %49 = arith.cmpi slt, %47, %48 : vector<1x128xi32>
    %50 = vector.shape_cast %49 : vector<1x128xi1> to vector<1x1x128xi1>
    %cst_26 = arith.constant 0.000000e+00 : f32
    %51 = vector.shape_cast %50 : vector<1x1x128xi1> to vector<1x1x128xi1>
    %52 = vector.broadcast %51 : vector<1x1x128xi1> to vector<1x16x128xi1>
    %53 = vector.broadcast %cst_26 : f32 to vector<1x16x128xf32>
    %54 = arith.select %52, %42, %53 : vector<1x16x128xi1>, vector<1x16x128xf32>
    %c9 = arith.constant 9 : index
    %c1_27 = arith.constant 1 : index
    %c0_28 = arith.constant 0 : index
    %55 = vector.load %arg11[%c9, %c1_27, %c0_28] : memref<10x18x128xf32, #tpu.memory_space<vmem>>, vector<1x16x128xf32>
    tpu.vector_store %arg11[%c9, %c1_27, %c0_28], %54 {strides = array<i32>} : memref<10x18x128xf32, #tpu.memory_space<vmem>>, vector<1x16x128xf32>,
    %cst_29 = arith.constant 0.000000e+00 : f32
    %56 = vector.broadcast %cst_29 : f32 to vector<10x1x128xf32>
    %c0_30 = arith.constant 0 : index
    %c0_31 = arith.constant 0 : index
    %c0_32 = arith.constant 0 : index
    %57 = vector.load %arg11[%c0_30, %c0_31, %c0_32] : memref<10x18x128xf32, #tpu.memory_space<vmem>>, vector<10x1x128xf32>
    tpu.vector_store %arg11[%c0_30, %c0_31, %c0_32], %56 {strides = array<i32>} : memref<10x18x128xf32, #tpu.memory_space<vmem>>, vector<10x1x128xf32>,
    %cst_33 = arith.constant 0.000000e+00 : f32
    %58 = vector.broadcast %cst_33 : f32 to vector<10x1x128xf32>
    %c0_34 = arith.constant 0 : index
    %c17 = arith.constant 17 : index
    %c0_35 = arith.constant 0 : index
    %59 = vector.load %arg11[%c0_34, %c17, %c0_35] : memref<10x18x128xf32, #tpu.memory_space<vmem>>, vector<10x1x128xf32>
    tpu.vector_store %arg11[%c0_34, %c17, %c0_35], %58 {strides = array<i32>} : memref<10x18x128xf32, #tpu.memory_space<vmem>>, vector<10x1x128xf32>,
    %c0_36 = arith.constant 0 : index
    %c0_37 = arith.constant 0 : index
    %c0_38 = arith.constant 0 : index
    %60 = vector.load %arg11[%c0_36, %c0_37, %c0_38] : memref<10x18x128xf32, #tpu.memory_space<vmem>>, vector<10x16x128xf32>
    %61 = vector.extract_strided_slice %60 {offsets = [0, 0, 0], sizes = [8, 16, 128], strides = [1, 1, 1]} : vector<10x16x128xf32> to vector<8x16x128xf32>
    %c0_39 = arith.constant 0 : index
    %c0_40 = arith.constant 0 : index
    %62 = vector.load %arg8[%c0_39, %c0_40] : memref<9x128xf32, #tpu.memory_space<vmem>>, vector<1x128xf32>
    %63 = vector.shape_cast %62 : vector<1x128xf32> to vector<128xf32>
    %64 = vector.shape_cast %63 : vector<128xf32> to vector<1x1x128xf32>
    %65 = vector.broadcast %64 : vector<1x1x128xf32> to vector<8x16x128xf32>
    %66 = arith.mulf %61, %65 : vector<8x16x128xf32>
    %67 = vector.extract_strided_slice %60 {offsets = [1, 0, 0], sizes = [8, 16, 128], strides = [1, 1, 1]} : vector<10x16x128xf32> to vector<8x16x128xf32>
    %c3 = arith.constant 3 : index
    %c0_41 = arith.constant 0 : index
    %68 = vector.load %arg8[%c3, %c0_41] : memref<9x128xf32, #tpu.memory_space<vmem>>, vector<1x128xf32>
    %69 = vector.shape_cast %68 : vector<1x128xf32> to vector<128xf32>
    %70 = vector.shape_cast %69 : vector<128xf32> to vector<1x1x128xf32>
    %71 = vector.broadcast %70 : vector<1x1x128xf32> to vector<8x16x128xf32>
    %72 = arith.mulf %67, %71 : vector<8x16x128xf32>
    %73 = arith.addf %66, %72 : vector<8x16x128xf32>
    %74 = vector.extract_strided_slice %60 {offsets = [2, 0, 0], sizes = [8, 16, 128], strides = [1, 1, 1]} : vector<10x16x128xf32> to vector<8x16x128xf32>
    %c6 = arith.constant 6 : index
    %c0_42 = arith.constant 0 : index
    %75 = vector.load %arg8[%c6, %c0_42] : memref<9x128xf32, #tpu.memory_space<vmem>>, vector<1x128xf32>
    %76 = vector.shape_cast %75 : vector<1x128xf32> to vector<128xf32>
    %77 = vector.shape_cast %76 : vector<128xf32> to vector<1x1x128xf32>
    %78 = vector.broadcast %77 : vector<1x1x128xf32> to vector<8x16x128xf32>
    %79 = arith.mulf %74, %78 : vector<8x16x128xf32>
    %80 = arith.addf %73, %79 : vector<8x16x128xf32>
    %c0_43 = arith.constant 0 : index
    %c1_44 = arith.constant 1 : index
    %c0_45 = arith.constant 0 : index
    %81 = vector.load %arg11[%c0_43, %c1_44, %c0_45] : memref<10x18x128xf32, #tpu.memory_space<vmem>>, vector<10x16x128xf32>
    %82 = vector.extract_strided_slice %81 {offsets = [0, 0, 0], sizes = [8, 16, 128], strides = [1, 1, 1]} : vector<10x16x128xf32> to vector<8x16x128xf32>
    %c1_46 = arith.constant 1 : index
    %c0_47 = arith.constant 0 : index
    %83 = vector.load %arg8[%c1_46, %c0_47] : memref<9x128xf32, #tpu.memory_space<vmem>>, vector<1x128xf32>
    %84 = vector.shape_cast %83 : vector<1x128xf32> to vector<128xf32>
    %85 = vector.shape_cast %84 : vector<128xf32> to vector<1x1x128xf32>
    %86 = vector.broadcast %85 : vector<1x1x128xf32> to vector<8x16x128xf32>
    %87 = arith.mulf %82, %86 : vector<8x16x128xf32>
    %88 = arith.addf %80, %87 : vector<8x16x128xf32>
    %89 = vector.extract_strided_slice %81 {offsets = [1, 0, 0], sizes = [8, 16, 128], strides = [1, 1, 1]} : vector<10x16x128xf32> to vector<8x16x128xf32>
    %c4 = arith.constant 4 : index
    %c0_48 = arith.constant 0 : index
    %90 = vector.load %arg8[%c4, %c0_48] : memref<9x128xf32, #tpu.memory_space<vmem>>, vector<1x128xf32>
    %91 = vector.shape_cast %90 : vector<1x128xf32> to vector<128xf32>
    %92 = vector.shape_cast %91 : vector<128xf32> to vector<1x1x128xf32>
    %93 = vector.broadcast %92 : vector<1x1x128xf32> to vector<8x16x128xf32>
    %94 = arith.mulf %89, %93 : vector<8x16x128xf32>
    %95 = arith.addf %88, %94 : vector<8x16x128xf32>
    %96 = vector.extract_strided_slice %81 {offsets = [2, 0, 0], sizes = [8, 16, 128], strides = [1, 1, 1]} : vector<10x16x128xf32> to vector<8x16x128xf32>
    %c7 = arith.constant 7 : index
    %c0_49 = arith.constant 0 : index
    %97 = vector.load %arg8[%c7, %c0_49] : memref<9x128xf32, #tpu.memory_space<vmem>>, vector<1x128xf32>
    %98 = vector.shape_cast %97 : vector<1x128xf32> to vector<128xf32>
    %99 = vector.shape_cast %98 : vector<128xf32> to vector<1x1x128xf32>
    %100 = vector.broadcast %99 : vector<1x1x128xf32> to vector<8x16x128xf32>
    %101 = arith.mulf %96, %100 : vector<8x16x128xf32>
    %102 = arith.addf %95, %101 : vector<8x16x128xf32>
    %c0_50 = arith.constant 0 : index
    %c2 = arith.constant 2 : index
    %c0_51 = arith.constant 0 : index
    %103 = vector.load %arg11[%c0_50, %c2, %c0_51] : memref<10x18x128xf32, #tpu.memory_space<vmem>>, vector<10x16x128xf32>
    %104 = vector.extract_strided_slice %103 {offsets = [0, 0, 0], sizes = [8, 16, 128], strides = [1, 1, 1]} : vector<10x16x128xf32> to vector<8x16x128xf32>
    %c2_52 = arith.constant 2 : index
    %c0_53 = arith.constant 0 : index
    %105 = vector.load %arg8[%c2_52, %c0_53] : memref<9x128xf32, #tpu.memory_space<vmem>>, vector<1x128xf32>
    %106 = vector.shape_cast %105 : vector<1x128xf32> to vector<128xf32>
    %107 = vector.shape_cast %106 : vector<128xf32> to vector<1x1x128xf32>
    %108 = vector.broadcast %107 : vector<1x1x128xf32> to vector<8x16x128xf32>
    %109 = arith.mulf %104, %108 : vector<8x16x128xf32>
    %110 = arith.addf %102, %109 : vector<8x16x128xf32>
    %111 = vector.extract_strided_slice %103 {offsets = [1, 0, 0], sizes = [8, 16, 128], strides = [1, 1, 1]} : vector<10x16x128xf32> to vector<8x16x128xf32>
    %c5 = arith.constant 5 : index
    %c0_54 = arith.constant 0 : index
    %112 = vector.load %arg8[%c5, %c0_54] : memref<9x128xf32, #tpu.memory_space<vmem>>, vector<1x128xf32>
    %113 = vector.shape_cast %112 : vector<1x128xf32> to vector<128xf32>
    %114 = vector.shape_cast %113 : vector<128xf32> to vector<1x1x128xf32>
    %115 = vector.broadcast %114 : vector<1x1x128xf32> to vector<8x16x128xf32>
    %116 = arith.mulf %111, %115 : vector<8x16x128xf32>
    %117 = arith.addf %110, %116 : vector<8x16x128xf32>
    %118 = vector.extract_strided_slice %103 {offsets = [2, 0, 0], sizes = [8, 16, 128], strides = [1, 1, 1]} : vector<10x16x128xf32> to vector<8x16x128xf32>
    %c8 = arith.constant 8 : index
    %c0_55 = arith.constant 0 : index
    %119 = vector.load %arg8[%c8, %c0_55] : memref<9x128xf32, #tpu.memory_space<vmem>>, vector<1x128xf32>
    %120 = vector.shape_cast %119 : vector<1x128xf32> to vector<128xf32>
    %121 = vector.shape_cast %120 : vector<128xf32> to vector<1x1x128xf32>
    %122 = vector.broadcast %121 : vector<1x1x128xf32> to vector<8x16x128xf32>
    %123 = arith.mulf %118, %122 : vector<8x16x128xf32>
    %124 = arith.addf %117, %123 : vector<8x16x128xf32>
    %c0_56 = arith.constant 0 : index
    %c0_57 = arith.constant 0 : index
    %125 = vector.load %arg9[%c0_56, %c0_57] : memref<1x128xf32, #tpu.memory_space<vmem>>, vector<1x128xf32>
    %126 = vector.shape_cast %125 : vector<1x128xf32> to vector<1x1x128xf32>
    %127 = vector.broadcast %126 : vector<1x1x128xf32> to vector<8x16x128xf32>
    %128 = arith.addf %124, %127 : vector<8x16x128xf32>
    %c0_58 = arith.constant 0 : index
    %c0_59 = arith.constant 0 : index
    %c0_60 = arith.constant 0 : index
    %c0_61 = arith.constant 0 : index
    %129 = vector.load %arg10[%c0_58, %c0_59, %c0_60, %c0_61] : memref<1x8x16x128xf32, #tpu.memory_space<vmem>>, vector<1x8x16x128xf32>
    %130 = vector.shape_cast %129 : vector<1x8x16x128xf32> to vector<8x16x128xf32>
    %131 = vector.shape_cast %128 : vector<8x16x128xf32> to vector<1x8x16x128xf32>
    tpu.vector_store %arg10[%c0_58, %c0_59, %c0_60, %c0_61], %131 {strides = array<i32>} : memref<1x8x16x128xf32, #tpu.memory_space<vmem>>, vector<1x8x16x128xf32>,
    return
  }
  func.func @transform_0(%arg0: i32, %arg1: i32, %arg2: i32) -> (i32, i32, i32, i32) {
    %c8_i32 = arith.constant 8 : i32
    %0 = arith.muli %arg1, %c8_i32 : i32
    %c1_i32 = arith.constant 1 : i32
    %1 = arith.subi %0, %c1_i32 : i32
    %c0_i32 = arith.constant 0 : i32
    %2 = arith.maxsi %1, %c0_i32 : i32
    %c0_i32_0 = arith.constant 0 : i32
    %c0_i32_1 = arith.constant 0 : i32
    %c0_i32_2 = arith.constant 0 : i32
    return %arg0, %2, %c0_i32_0, %c0_i32_1 : i32, i32, i32, i32
  }
  func.func @transform_1(%arg0: i32, %arg1: i32, %arg2: i32) -> (i32, i32, i32, i32) {
    %c0_i32 = arith.constant 0 : i32
    %c0_i32_0 = arith.constant 0 : i32
    %c0_i32_1 = arith.constant 0 : i32
    return %arg0, %arg1, %c0_i32, %c0_i32_0 : i32, i32, i32, i32
  }
  func.func @transform_2(%arg0: i32, %arg1: i32, %arg2: i32) -> (i32, i32, i32, i32) {
    %c1_i32 = arith.constant 1 : i32
    %0 = arith.addi %arg1, %c1_i32 : i32
    %c8_i32 = arith.constant 8 : i32
    %1 = arith.muli %0, %c8_i32 : i32
    %c15_i32 = arith.constant 15 : i32
    %2 = arith.minsi %1, %c15_i32 : i32
    %c0_i32 = arith.constant 0 : i32
    %c0_i32_0 = arith.constant 0 : i32
    %c0_i32_1 = arith.constant 0 : i32
    return %arg0, %2, %c0_i32, %c0_i32_0 : i32, i32, i32, i32
  }
  func.func @transform_3(%arg0: i32, %arg1: i32, %arg2: i32) -> (i32, i32) {
    %c0_i32 = arith.constant 0 : i32
    %c0_i32_0 = arith.constant 0 : i32
    return %c0_i32, %arg2 : i32, i32
  }
  func.func @transform_4(%arg0: i32, %arg1: i32, %arg2: i32) -> (i32, i32) {
    %c0_i32 = arith.constant 0 : i32
    %c0_i32_0 = arith.constant 0 : i32
    return %c0_i32, %arg2 : i32, i32
  }
  func.func @transform_5(%arg0: i32, %arg1: i32, %arg2: i32) -> (i32, i32) {
    %c0_i32 = arith.constant 0 : i32
    %c0_i32_0 = arith.constant 0 : i32
    return %c0_i32, %arg2 : i32, i32
  }
  func.func @transform_6(%arg0: i32, %arg1: i32, %arg2: i32) -> (i32, i32) {
    %c0_i32 = arith.constant 0 : i32
    %c0_i32_0 = arith.constant 0 : i32
    return %c0_i32, %arg2 : i32, i32
  }
  func.func @transform_7(%arg0: i32, %arg1: i32, %arg2: i32) -> (i32, i32, i32, i32) {
    %c0_i32 = arith.constant 0 : i32
    %c0_i32_0 = arith.constant 0 : i32
    return %arg0, %arg1, %c0_i32, %arg2 : i32, i32, i32, i32
  }
}

</mosaic_0001>

<bundles_post_ra>
// kernel: tpu_custom_call.1
= control target key start
LH: loop header
LB: loop body
LE: loop exit
PB: predicated region body
PF: predicated region fallthrough
CT: control target
= control target key end

     0   :  { %s3287_s0 = inlined_call_operand.hbm [shape: bf16[2,16,16,128], index: 0, kind: input, shape index: {}]   ;;  %s3288_s1 = inlined_call_operand.hbm [shape: bf16[2,16,16,128], index: 1, kind: input, shape index: {}]   ;;  %s3289_s2 = inlined_call_operand.hbm [shape: bf16[2,16,16,128], index: 2, kind: input, shape index: {}]   ;;  %s3290_s3 = inlined_call_operand.hbm [shape: bf16[128,128], index: 3, kind: input, shape index: {}]   ;;  %s3291_s4 = inlined_call_operand.vmem [shape: f32[1,128], index: 4, kind: input, shape index: {}]   ;;  %s3292_s5 = inlined_call_operand.vmem [shape: f32[9,128], index: 5, kind: input, shape index: {}]   ;;  %s3293_s6 = inlined_call_operand.vmem [shape: f32[1,128], index: 6, kind: input, shape index: {}]   ;;  %s3294_s7 = inlined_call_operand.hbm [shape: f32[2,16,16,128], index: 7, kind: output, shape index: {}]  }
   0x1   :  { %3326 = sst [smem:[#allocation31_spill]] %s3288_s1 }
   0x2   :  { %3327 = sst [smem:[#allocation32_spill]] %s3289_s2 }
   0x3   :  { %3328 = sst [smem:[#allocation33_spill]] %s3290_s3 }
   0x4   :  { %3329 = sst [smem:[#allocation34_spill]] %s3291_s4 }
   0x5   :  { %3330 = sst [smem:[#allocation35_spill]] %s3292_s5 }
   0x6   :  { %3331 = sst [smem:[#allocation36_spill]] %s3293_s6 }
   0x7   :  { %3332 = sst [smem:[#allocation37_spill]] %s3294_s7 }
   0x8   :  { %12 = vsyncpa [#allocation4], 0 }
   0x9   :  { %14 = vsyncpa [#allocation4 + $0x1], 0 }
   0xa   :  { %15 = vsyncpa [#allocation7], 0 }
   0xb   :  { %17 = vsyncpa [#allocation7 + $0x1], 0 }
   0xc   :  { %18 = vsyncpa [#allocation10], 0 }
   0xd   :  { %19 = vsyncpa [#allocation5], 0 }
   0xe   :  { %21 = vsyncpa [#allocation5 + $0x1], 0  ;;  %s2255_s24 = smov 0   ;;  %s2257_s25 = smov 0  }
   0xf   :  { %s2259_s26 = smov 0   ;;  %s2261_s27 = smov 0  }
  0x10   :  { %s2263_s28 = smov 0   ;;  %s2265_s29 = smov 0  }
  0x11   :  { %s2267_s30 = smov 0   ;;  %s2269_s8 = smov 0  }
  0x12   :  { %s2271_s9 = smov 0   ;;  %s2273_s10 = smov 0  }
  0x13   :  { %s2275_s11 = smov 0   ;;  %s2277_s12 = smov 0  }
  0x14   :  { %s2279_s13 = smov 0   ;;  %s2281_s14 = smov 0  }
  0x15 LB: > { %3333 = sst [smem:[#allocation17_spill]] %s2161_s27  ;;  %s1563_s15 = sadd.s32 4294967294, %s2201_s14   ;;  %s2201_s14 = sphi %s2281_s14, %s27_s14   ;;  %s2197_s13 = sphi %s2279_s13, %s3405_s13   ;;  %s2193_s12 = sphi %s2277_s12, %s3404_s12   ;;  %s2189_s11 = sphi %s2275_s11, %s3403_s11   ;;  %s2185_s10 = sphi %s2273_s10, %s3413_s10   ;;  %s2181_s9 = sphi %s2271_s9, %s3412_s9   ;;  %s2177_s8 = sphi %s2269_s8, %s3411_s8   ;;  %s2173_s30 = sphi %s2267_s30, %s3400_s30   ;;  %s2169_s29 = sphi %s2265_s29, %s3410_s29   ;;  %s2165_s28 = sphi %s2263_s28, %s3409_s28   ;;  %s2161_s27 = sphi %s2261_s27, %s3399_s27   ;;  %s2157_s26 = sphi %s2259_s26, %s3408_s26   ;;  %s2153_s25 = sphi %s2257_s25, %s3407_s25   ;;  %s2149_s24 = sphi %s2255_s24, %s3406_s24  }
  0x16   : > { %3334 = sst [smem:[#allocation18_spill]] %s2165_s28  ;;  %s42_s16 = sadd.s32 1, %s2193_s12 }
  0x17   : > { %3335 = sst [smem:[#allocation19_spill]] %s2177_s8  ;;  %p44_p0 = scmp.ge.s32.totalorder %s42_s16, 2 }
  0x18   : > { %3336 = sst [smem:[#allocation20_spill]] %s2185_s10  ;;  %s46_s17 = sadd.s32 1, %s2197_s13 }
  0x19   : > { %3337 = sst [smem:[#allocation21_spill]] %s2189_s11  ;;  %p3300_p1 = scmp.eq.s32.totalorder %s2201_s14, 0 }
  0x1a   : > { %3338 = sst [smem:[#allocation22_spill]] %s2193_s12  ;;  %s3415_s16 = smov (%p44_p0, %s42_s16), 0 }
  0x1b   : > { %3339 = sst [smem:[#allocation23_spill]] %s2197_s13  ;;  %s3417_s17 = smov (!%p44_p0, %s46_s17), %s2197_s13 }
  0x1c   : > { %3340 = sst [smem:[#allocation24_spill]] %s3415_s16  ;;  %p3301_p2 = scmp.ne.s32.totalorder %s2169_s29, %s2165_s28 }
  0x1d   : > { %p3302_p3 = scmp.ne.s32.totalorder %s2165_s28, %s2161_s27  ;;  %p278_p4 = scmp.eq.s32.totalorder %s1563_s15, 3 }
  0x1e   : > { %p2346_p5 = por %p3301_p2, %p3300_p1  ;;  %p3299_p7 = scmp.lt.s32.totalorder %s2201_s14, 4 }
  0x1f   : > { %p2353_p6 = por %p278_p4, %p3302_p3  ;;  %s2359_s22 = sshll.u32 %s2197_s13, 5 }
  0x20   : > { %s359_s23 = sand.u32 1, %s2201_s14   ;;  %s361_s18 = sand.u32 1, %s2169_s29  }
  0x21   : > { %s3342_s21 = scalar_select %p2353_p6, 1, 0 }
  0x22   : > { %s1582_s19 = sshll.u32 %s361_s18, 6  ;;  %s1641_s15 = sshll.u32 %s2193_s12, 4 }
  0x23   : > { %3343 = sst [smem:[#allocation25_spill]] %s3342_s21  ;;  %s370_s7 = sadd.s32 %s1641_s15, %s2359_s22 }
  0x24   : > { %s1586_s11 = sshll.u32 %s370_s7, 6  ;;  %s363_s6 = scalar_lea.vmem [#allocation6], %s1582_s19 }
  0x25   : > { %s373_s5 = sshll.u32 %s363_s6, 4  ;;  %s3344_s1 = sld [smem:[#allocation31_spill]]  ;;  %s2370_s5 = int_to_ptr.vmem [resolvable:$true] %s373_s5 }
  0x26   : > { %p2376_p8 = pnand %p3299_p7, %p2346_p5  ;;  %s2380_s6 = scalar_lea.sflag [#allocation7], %s359_s23 }
  0x28   : > { %p1927_p10 = pneg %p2376_p8 }
  0x2b   : > { %s2368_s2 = scalar_lea.hbm %s3344_s1, %s1586_s11  ;;  %s1930_s11 = scalar_lea.hbm %s3344_s1, 4096 }
  0x2c   : > { %s1925_s7 = scalar_lea.hbm %s2368_s2, 1024  ;;  %p1931_p13 = scmp.lt.u32.totalorder %s2368_s2, %s3344_s1 }
  0x2d   : > { %p1926_p9 = scmp.ne.s32.totalorder %s2368_s2, %s1925_s7  ;;  %p1932_p0 = scmp.lt.u32.totalorder %s1930_s11, %s1925_s7 }
  0x2e   : > { %p1934_p5 = scmp.lt.u32.totalorder %s1925_s7, %s2368_s2 }
  0x2f   : > { %p1928_p11 = pnand %p1927_p10, %p1926_p9  ;;  %p1933_p4 = por %p1932_p0, %p1931_p13 }
  0x31   : > { %p1929_p12 = pneg %p1928_p11  ;;  %p1935_p7 = por %p1934_p5, %p1933_p4 }
  0x33   : > { %p1936_p1 = pnand %p1935_p7, %p1929_p12 }
  0x35   : > { %1939 = shalt.err (!%p1936_p1)
}
  0x36   : > { %s1940_s23 = scalar_lea.vmem %s2370_s5, 1024  ;;  %s2203_s15 = smov [#allocation6]  }
  0x37   : > { %p1941_p9 = scmp.ne.s32.totalorder %s2370_s5, %s1940_s23  ;;  %s1945_s4 = sshll.u32 %s2203_s15, 4  ;;  %s1946_s4 = int_to_ptr.vmem [resolvable:$false] %s1945_s4 }
  0x38   : > { %s1947_s10 = scalar_lea.vmem %s1946_s4, 2048  ;;  %p1948_p3 = scmp.lt.s32.totalorder %s2370_s5, %s1946_s4 }
  0x39   : > { %p1943_p11 = pnand %p1941_p9, %p1927_p10  ;;  %p1949_p13 = scmp.lt.s32.totalorder %s1947_s10, %s1940_s23 }
  0x3b   : > { %p1944_p2 = pneg %p1943_p11  ;;  %p1950_p0 = por %p1949_p13, %p1948_p3 }
  0x3d   : > { %p1951_p4 = pnand %p1950_p0, %p1944_p2 }
  0x3f   : > { %1954 = shalt.err (!%p1951_p4)
}
  0x40   : > { %s3303_s7 = smov 64   ;;  %s3305_s11 = smov 4  }
  0x41   : > { %1775 = dma.hbm_to_vmem [thread:$0]  (!%p2376_p8), %s2368_s2, 1024, %s2370_s5, %s2380_s6, %s3303_s7, %s3303_s7, %s3305_s11  }
  0x42   : > { %s2412_s19 = sadd.s32 4294967295, %s2201_s14   ;;  %p1570_p1 = scmp.ge.s32.totalorder %s2201_s14, 1 }
  0x43   : > { %p3309_p2 = scmp.eq.s32.totalorder %s2412_s19, 0  ;;  %p272_p3 = scmp.eq.s32.totalorder %s2412_s19, 3 }
  0x44   : > { %p285_p7 = scmp.lt.s32.totalorder %s2201_s14, 5  ;;  %p3346_p10 = scmp.ne.s32.totalorder %s2165_s28, %s2161_s27 }
  0x45   : > { %p3349_p5 = scmp.ne.s32.totalorder %s2169_s29, %s2165_s28  ;;  %s2206_s5 = smov [#allocation9]  }
  0x46   : > { %p2423_p12 = por %p3346_p10, %p3309_p2  ;;  %p2434_p8 = pnand %p1570_p1, %p285_p7 }
  0x47   : > { %p2430_p9 = por %p272_p3, %p3349_p5  ;;  %s299_s23 = sshll.u32 %s2206_s5, 4  ;;  %s300_s23 = int_to_ptr.vmem [resolvable:$true] %s299_s23 }
  0x48   : > { %s3347_s20 = scalar_select %p2423_p12, 1, 0 }
  0x49   : > { %s3350_s18 = scalar_select %p2430_p9, 1, 0 }
  0x4a   : > { %3348 = sst [smem:[#allocation26_spill]] %s3347_s20  ;;  %p1765_p11 = pneg %p2434_p8 }
  0x4b   : > { %3351 = sst [smem:[#allocation27_spill]] %s3350_s18  ;;  %s3354_s3 = sld [smem:[#allocation33_spill]] }
  0x4c   : > { %s3352_s2 = scalar_select %p2434_p8, 1, 0 }
  0x4d   : > { %p2442_p13 = pnand %p1765_p11, %p3309_p2 }
  0x4f   : > { %p1957_p1 = pneg %p2442_p13 }
  0x51   : > { %s1955_s7 = scalar_lea.hbm %s3354_s3, 1024 }
  0x52   : > { %p1956_p4 = scmp.ne.s32.totalorder %s3354_s3, %s1955_s7  ;;  %p1962_p10 = scmp.lt.u32.totalorder %s1955_s7, %s3354_s3 }
  0x54   : > { %p1958_p3 = pnand %p1957_p1, %p1956_p4 }
  0x56   : > { %p1959_p7 = pneg %p1958_p3 }
  0x58   : > { %p1964_p5 = pnand %p1962_p10, %p1959_p7 }
  0x5a   : > { %1967 = shalt.err (!%p1964_p5)
}
  0x5b   : > { %s1968_s27 = scalar_lea.vmem %s300_s23, 1024  ;;  %p1976_p6 = scmp.lt.s32.totalorder %s300_s23, %s300_s23 }
  0x5c   : > { %p1969_p11 = scmp.ne.s32.totalorder %s300_s23, %s1968_s27  ;;  %p1977_p9 = scmp.lt.s32.totalorder %s1968_s27, %s1968_s27 }
  0x5e   : > { %p1971_p2 = pnand %p1969_p11, %p1957_p1  ;;  %p1978_p12 = por %p1977_p9, %p1976_p6 }
  0x60   : > { %p1972_p0 = pneg %p1971_p2 }
  0x62   : > { %p1979_p8 = pnand %p1978_p12, %p1972_p0 }
  0x64   : > { %1982 = shalt.err (!%p1979_p8)
}
  0x65   : > { %s3355_s1 = smov 4   ;;  %s3356_s11 = smov 64  }
  0x66   : > { %1768 = dma.hbm_to_vmem [thread:$0]  (!%p2442_p13), %s3354_s3, 1024, %s300_s23, [#allocation10], %s3356_s11, %s3356_s11, %s3355_s1  }
  0x67   : > { %p3357_p6 = scmp.ge.s32.totalorder %s3417_s17, 2  ;;  %s1564_s27 = sshll.u32 %s2193_s12, 3 }
  0x68   : > { %s1566_s21 = sshll.u32 %s3415_s16, 3  ;;  %s1565_s7 = sadd.s32 4294967295, %s1564_s27 }
  0x69   : > { %s3419_s17 = smov (%p3357_p6, %s3417_s17), 0  ;;  %s1567_s15 = sadd.s32 4294967295, %s1566_s21 }
  0x6a   : > { %3358 = sst [smem:[#allocation28_spill]] %s3419_s17  ;;  %p52_p2 = scmp.gt.s32.totalorder %s1565_s7, 0 }
  0x6b   : > { %p56_p12 = scmp.gt.s32.totalorder %s1567_s15, 0  ;;  %s2475_s5 = ssub.s32 %s2197_s13, %s3419_s17 }
  0x6c   : > { %s63_s23 = sadd.s32 1, %s2181_s9  ;;  %s3421_s7 = smov (!%p52_p2, %s1565_s7), 0 }
  0x6d   : > { %s3423_s15 = smov (!%p56_p12, %s1567_s15), 0  ;;  %p70_p9 = scmp.ne.s32.totalorder %s2181_s9, %s2177_s8 }
  0x6e   : > { %p76_p8 = scmp.ne.s32.totalorder %s2177_s8, %s2173_s30  ;;  %s59_s4 = ssub.s32 %s3421_s7, %s3423_s15 }
  0x6f   : > { %s3359_s10 = ssub.s32 %s2193_s12, %s3415_s16  ;;  %s60_s18 = sor.u32 %s59_s4, %s2475_s5 }
  0x70   : > { %s88_s3 = sor.u32 %s3359_s10, %s2475_s5  ;;  %p3360_p13 = scmp.eq.s32.totalorder %s2201_s14, 0 }
  0x71   : > { %p61_p4 = scmp.eq.s32.totalorder %s60_s18, 0  ;;  %p3362_p1 = scmp.eq.s32.totalorder %s2412_s19, 0 }
  0x72   : > { %p2489_p0 = por %p3360_p13, %p70_p9  ;;  %p89_p7 = scmp.eq.s32.totalorder %s88_s3, 0 }
  0x73   : > { %p2495_p3 = por %p3362_p1, %p76_p8  ;;  %s2499_s30 = sadd.s32 8, %s1564_s27 }
  0x74   : > { %s2502_s15 = scalar_select %p61_p4, %s2181_s9, %s63_s23  }
  0x75   : > { %s3363_s17 = scalar_select %p2495_p3, 1, 0 }
  0x76   : > { %3365 = sst [smem:[#allocation30_spill]] %s2502_s15  ;;  %s3366_s4 = sadd.s32 1, %s2169_s29 }
  0x77   : > { %3364 = sst [smem:[#allocation29_spill]] %s3363_s17  ;;  %s2510_s16 = sadd.s32 8, %s1566_s21 }
  0x78   : > { %s2507_s10 = scalar_select %p89_p7, %s2169_s29, %s3366_s4  }
  0x79   : > { %s332_s18 = sand.u32 1, %s2181_s9   ;;  %s1579_s12 = sshll.u32 %s3421_s7, 1 }
  0x7a   : > { %s1576_s13 = sshll.u32 %s332_s18, 3  ;;  %s346_s28 = sadd.s32 %s2359_s22, %s1579_s12 }
  0x7b   : > { %s336_s3 = scalar_lea.vmem [#allocation3], %s1576_s13  ;;  %s1581_s8 = sshll.u32 %s346_s28, 6 }
  0x7c   : > { %s349_s17 = sshll.u32 %s336_s3, 4  ;;  %s2520_s15 = scalar_lea.hbm %s3287_s0, %s1581_s8  ;;  %s2515_s17 = int_to_ptr.vmem [resolvable:$true] %s349_s17 }
  0x7d   : > { %p3367_p11 = scmp.lt.s32.totalorder %s2201_s14, 4  ;;  %s2530_s28 = scalar_lea.sflag [#allocation4], %s332_s18 }
  0x7e   : > { %s1983_s12 = scalar_lea.hbm %s2520_s15, 128  ;;  %s1988_s20 = scalar_lea.hbm %s3287_s0, 4096 }
  0x7f   : > { %p2526_p6 = pnand %p3367_p11, %p2489_p0  ;;  %p1984_p2 = scmp.ne.s32.totalorder %s2520_s15, %s1983_s12 }
  0x80   : > { %p1989_p13 = scmp.lt.u32.totalorder %s2520_s15, %s3287_s0  ;;  %p1990_p0 = scmp.lt.u32.totalorder %s1988_s20, %s1983_s12 }
  0x81   : > { %p1985_p12 = pneg %p2526_p6  ;;  %p1992_p1 = scmp.lt.u32.totalorder %s1983_s12, %s2520_s15 }
  0x82   : > { %p1991_p4 = por %p1990_p0, %p1989_p13 }
  0x83   : > { %p1986_p9 = pnand %p1985_p12, %p1984_p2 }
  0x84   : > { %p1993_p7 = por %p1992_p1, %p1991_p4 }
  0x85   : > { %p1987_p8 = pneg %p1986_p9 }
  0x87   : > { %p1994_p11 = pnand %p1993_p7, %p1987_p8 }
  0x89   : > { %1997 = shalt.err (!%p1994_p11)
}
  0x8a   : > { %s1998_s18 = scalar_lea.vmem %s2515_s17, 128  ;;  %s2207_s3 = smov [#allocation3]  }
  0x8b   : > { %p1999_p2 = scmp.ne.s32.totalorder %s2515_s17, %s1998_s18  ;;  %s2003_s27 = sshll.u32 %s2207_s3, 4  ;;  %s2004_s27 = int_to_ptr.vmem [resolvable:$false] %s2003_s27 }
  0x8c   : > { %s2005_s23 = scalar_lea.vmem %s2004_s27, 256  ;;  %p2006_p10 = scmp.lt.s32.totalorder %s2515_s17, %s2004_s27 }
  0x8d   : > { %p2001_p9 = pnand %p1999_p2, %p1985_p12  ;;  %p2007_p13 = scmp.lt.s32.totalorder %s2005_s23, %s1998_s18 }
  0x8f   : > { %p2002_p5 = pneg %p2001_p9  ;;  %p2008_p0 = por %p2007_p13, %p2006_p10 }
  0x91   : > { %p2009_p4 = pnand %p2008_p0, %p2002_p5 }
  0x93   : > { %2012 = shalt.err (!%p2009_p4)
}
  0x94   : > { %1772 = dma.hbm_to_vmem [thread:$0]  (!%p2526_p6), %s2520_s15, 128, %s2515_s17, %s2530_s28, %s3356_s11, %s3356_s11, %s3355_s1  }
  0x95   : > { %s127_s21 = sadd.s32 1, %s2157_s26  ;;  %p3369_p10 = scmp.lt.s32.totalorder %s2499_s30, 15 }
  0x96   : > { %p3370_p5 = scmp.lt.s32.totalorder %s2510_s16, 15  ;;  %p134_p12 = scmp.ne.s32.totalorder %s2157_s26, %s2153_s25 }
  0x97   : > { %s3425_s30 = smov (!%p3369_p10, %s2499_s30), 15  ;;  %p140_p8 = scmp.ne.s32.totalorder %s2153_s25, %s2149_s24 }
  0x98   : > { %s3427_s16 = smov (!%p3370_p5, %s2510_s16), 15  ;;  %s385_s8 = sand.u32 1, %s2157_s26  }
  0x99   : > { %s123_s12 = ssub.s32 %s3425_s30, %s3427_s16  ;;  %p3371_p1 = scmp.eq.s32.totalorder %s2201_s14, 0 }
  0x9a   : > { %s124_s13 = sor.u32 %s123_s12, %s2475_s5  ;;  %p3372_p2 = scmp.eq.s32.totalorder %s2412_s19, 0 }
  0x9b   : > { %p136_p7 = por %p134_p12, %p3371_p1  ;;  %p125_p11 = scmp.eq.s32.totalorder %s124_s13, 0 }
  0x9c   : > { %p2578_p9 = por %p140_p8, %p3372_p2  ;;  %s1587_s17 = sshll.u32 %s385_s8, 3 }
  0x9d   : > { %s1589_s15 = sshll.u32 %s3425_s30, 1  ;;  %s387_s18 = scalar_lea.vmem [#allocation8], %s1587_s17 }
  0x9e   : > { %s3373_s20 = scalar_select %p2578_p9, 1, 0 }
  0x9f   : > { %s2583_s28 = scalar_select %p125_p11, %s2157_s26, %s127_s21  }
  0xa0   : > { %s397_s7 = sadd.s32 %s1589_s15, %s2359_s22  ;;  %s400_s24 = sshll.u32 %s387_s18, 4  ;;  %s2591_s24 = int_to_ptr.vmem [resolvable:$true] %s400_s24 }
  0xa1   : > { %s1591_s4 = sshll.u32 %s397_s7, 6  ;;  %s3374_s27 = sld [smem:[#allocation32_spill]] }
  0xa2   : > { %p3376_p6 = scmp.lt.s32.totalorder %s2201_s14, 4 }
  0xa4   : > { %p2595_p13 = pnand %p3376_p6, %p136_p7 }
  0xa6   : > { %p2015_p4 = pneg %p2595_p13 }
  0xa7   : > { %s3375_s23 = smov %s3374_s27  ;;  %s2589_s5 = scalar_lea.hbm %s3374_s27, %s1591_s4 }
  0xa8   : > { %s2013_s22 = scalar_lea.hbm %s2589_s5, 128  ;;  %s2018_s8 = scalar_lea.hbm %s3375_s23, 4096 }
  0xa9   : > { %p2014_p0 = scmp.ne.s32.totalorder %s2589_s5, %s2013_s22  ;;  %p2019_p12 = scmp.lt.u32.totalorder %s2589_s5, %s3375_s23 }
  0xaa   : > { %p2020_p8 = scmp.lt.u32.totalorder %s2018_s8, %s2013_s22  ;;  %p2022_p7 = scmp.lt.u32.totalorder %s2013_s22, %s2589_s5 }
  0xab   : > { %p2016_p10 = pnand %p2015_p4, %p2014_p0 }
  0xac   : > { %p2021_p1 = por %p2020_p8, %p2019_p12 }
  0xad   : > { %p2017_p5 = pneg %p2016_p10 }
  0xae   : > { %p2023_p11 = por %p2022_p7, %p2021_p1 }
  0xb0   : > { %p2024_p2 = pnand %p2023_p11, %p2017_p5 }
  0xb2   : > { %2027 = shalt.err (!%p2024_p2)
}
  0xb3   : > { %s2028_s15 = scalar_lea.vmem %s2591_s24, 128  ;;  %s2208_s7 = smov [#allocation8]  }
  0xb4   : > { %p2029_p6 = scmp.ne.s32.totalorder %s2591_s24, %s2028_s15  ;;  %s2033_s4 = sshll.u32 %s2208_s7, 4  ;;  %s2034_s4 = int_to_ptr.vmem [resolvable:$false] %s2033_s4 }
  0xb5   : > { %s2035_s18 = scalar_lea.vmem %s2034_s4, 256  ;;  %p2036_p9 = scmp.lt.s32.totalorder %s2591_s24, %s2034_s4 }
  0xb6   : > { %p2031_p0 = pnand %p2029_p6, %p2015_p4  ;;  %p2037_p12 = scmp.lt.s32.totalorder %s2035_s18, %s2028_s15 }
  0xb8   : > { %p2032_p10 = pneg %p2031_p0  ;;  %p2038_p8 = por %p2037_p12, %p2036_p9 }
  0xba   : > { %p2039_p1 = pnand %p2038_p8, %p2032_p10 }
  0xbc   : > { %2042 = shalt.err (!%p2039_p1)
}
  0xbd   : > { %1778 = dma.hbm_to_vmem [thread:$0]  (!%p2595_p13), %s2589_s5, 128, %s2591_s24, %s2380_s6, %s3356_s11, %s3356_s11, %s3355_s1  }
  0xbe   : > { %p3378_p4 = scmp.ne.s32.totalorder %s3352_s2, 0 }
  0xbf   : > { %s3379_s3 = sld [smem:[#allocation19_spill]] (!%p3378_p4) }
  0xc0   : > { %412 = sbr.rel (%p3378_p4) target bundleno = 569 (0x239), region = 48 }
  0xc5   : > { %s414_s27 = sand.u32 (!%p3378_p4), 1, %s3379_s3  }
  0xc6   : > { %s2631_s22 = sshll.u32 (!%p3378_p4), %s414_s27, 3  ;;  %s415_s21 = scalar_lea.sflag (!%p3378_p4), [#allocation4], %s414_s27 }
  0xc7   : > { %s418_s12 = scalar_lea.vmem [#allocation3], %s2631_s22 }
  0xc8   : > { %2128 = dma.done.wait (%p2495_p3), %s415_s21, 128  }
  0xc9   : > { %2130 = vsyncadd (%p2495_p3), %s415_s21, 4294967168  ;;  %s3381_s30 = sld [smem:[#allocation18_spill]]  ;;  %s3382_s8 = sld [smem:[#allocation26_spill]] }
  0xca   : > { %s423_s6 = sand.u32 1, %s2412_s19  }
  0xcb   : > { %s424_s11 = scalar_lea.sflag [#allocation7], %s423_s6 }
  0xcf   : > { %s2640_s1 = sand.u32 1, %s3381_s30   ;;  %p3383_p9 = scmp.ne.s32.totalorder %s3382_s8, 0 }
  0xd0   : > { %s1594_s2 = sshll.u32 %s2640_s1, 6 }
  0xd1   : > { %s2643_s24 = scalar_lea.vmem [#allocation6], %s1594_s2 }
  0xd2   : > { %2132 = dma.done.wait (%p3383_p9), %s424_s11, 1024  }
  0xd3   : > { %2134 = vsyncadd (%p3383_p9), %s424_s11, 4294966272  ;;  %s434_s5 = sand.u32 1, %s2153_s25   ;;  %p3384_p3 = scmp.ne.s32.totalorder %s3373_s20, 0 }
  0xd4   : > { %s2650_s13 = sshll.u32 %s434_s5, 3 }
  0xd5   : > { %s436_s17 = scalar_lea.vmem [#allocation8], %s2650_s13 }
  0xd6   : > { %2136 = dma.done.wait (%p3384_p3), %s424_s11, 128  }
  0xd7   : > { %2138 = vsyncadd (%p3384_p3), %s424_s11, 4294967168  ;;  %p3385_p13 = scmp.eq.s32.totalorder %s2412_s19, 0 }
  0xd9   : > { %2140 = dma.done.wait (%p3385_p13), [#allocation10], 1024   ;;  %p3386_p5 = pmov %p3385_p13 }
  0xda   : > { %v2209_v0 = vmov 0.0   ;;  %vm2210_vm0 = vmmov 0   ;;  %v1907_v1 = vld [vmem:[#allocation9] sm:$0xff]   ;;  %v1908_v2 = vld [vmem:[#allocation9 + $0x8] sm:$0xff]   ;;  %v1909_v3 = vld [vmem:[#allocation9 + $0x10] sm:$0xff]   ;;  %s3387_s19 = sld [smem:[#allocation20_spill]]  ;;  %v636_v19 = vlaneseq }
  0xdb   : > { %2142 = vsyncadd (%p3386_p5), [#allocation10], 4294966272  ;;  %1681 = vmatprep.subr.bf16.mxu0 %v2209_v0  ;;  %914 = vst [vmem:[#allocation2] sm:$0x1] %v2209_v0  ;;  %1697 = vmatprep.mubr.msk.bf16.mxu0 %vm2210_vm0, %v2209_v0  ;;  %v1910_v4 = vld [vmem:[#allocation9 + $0x18] sm:$0xff]   ;;  %v1916_v5 = vld [vmem:[%s2643_s24] sm:$0xff]  }
  0xdc   : > { %915 = vst [vmem:[#allocation2 + $0x18] sm:$0x1] %v2209_v0  ;;  %916 = vst [vmem:[#allocation2 + $0x30] sm:$0x1] %v2209_v0  ;;  %1682 = vmatpush3.bf16.msra.mxu0 %v1907_v1  ;;  %1701 = vmatprep.subr.bf16.mxu1 %v1907_v1  ;;  %v1911_v6 = vld [vmem:[#allocation9 + $0x20] sm:$0xff]   ;;  %v1912_v7 = vld [vmem:[#allocation9 + $0x28] sm:$0xff]  }
  0xdd   : > { %917 = vst [vmem:[#allocation2 + $0x48] sm:$0x1] %v2209_v0  ;;  %918 = vst [vmem:[#allocation2 + $0x60] sm:$0x1] %v2209_v0  ;;  %1702 = vmatpush3.bf16.msra.mxu1 %v1907_v1  ;;  %1683 = vmatprep.subr.bf16.mxu0 %v2209_v0  ;;  %v1913_v8 = vld [vmem:[#allocation9 + $0x30] sm:$0xff]   ;;  %v1914_v9 = vld [vmem:[#allocation9 + $0x38] sm:$0xff]  }
  0xde   : > { %919 = vst [vmem:[#allocation2 + $0x78] sm:$0x1] %v2209_v0  ;;  %920 = vst [vmem:[#allocation2 + $0x90] sm:$0x1] %v2209_v0  ;;  %1703 = vmatprep.subr.bf16.mxu1 %v1908_v2  ;;  %1717 = vmatprep.mubr.bf16.mxu1 %v1916_v5  ;;  %v1915_v10 = vld [vmem:[%s418_s12] sm:$0xff]   ;;  %v1917_v11 = vld [vmem:[%s2643_s24 + $0x8] sm:$0xff]  }
  0xdf   : > { %921 = vst [vmem:[#allocation2 + $0xa8] sm:$0x1] %v2209_v0  ;;  %922 = vst [vmem:[#allocation2 + $0xc0] sm:$0x1] %v2209_v0  ;;  %v1918_v12 = vld [vmem:[%s2643_s24 + $0x10] sm:$0xff]   ;;  %v1919_v13 = vld [vmem:[%s2643_s24 + $0x18] sm:$0xff]  }
  0xe0   : > { %923 = vst [vmem:[#allocation2 + $0xd8] sm:$0x1] %v2209_v0  ;;  %924 = vst [vmem:[#allocation2 + $0x11] sm:$0x1] %v2209_v0  ;;  %1684 = vmatpush3.bf16.msra.mxu0 %v1908_v2  ;;  %v1920_v14 = vld [vmem:[%s2643_s24 + $0x20] sm:$0xff]   ;;  %v1921_v15 = vld [vmem:[%s2643_s24 + $0x28] sm:$0xff]  }
  0xe1   : > { %925 = vst [vmem:[#allocation2 + $0x29] sm:$0x1] %v2209_v0  ;;  %926 = vst [vmem:[#allocation2 + $0x41] sm:$0x1] %v2209_v0  ;;  %1704 = vmatpush3.bf16.msra.mxu1 %v1908_v2  ;;  %1685 = vmatprep.subr.bf16.mxu0 %v2209_v0  ;;  %v1922_v16 = vld [vmem:[%s2643_s24 + $0x30] sm:$0xff]   ;;  %v1923_v17 = vld [vmem:[%s2643_s24 + $0x38] sm:$0xff]  }
  0xe2   : > { %927 = vst [vmem:[#allocation2 + $0x59] sm:$0x1] %v2209_v0  ;;  %928 = vst [vmem:[#allocation2 + $0x71] sm:$0x1] %v2209_v0  ;;  %1705 = vmatprep.subr.bf16.mxu1 %v1909_v3  ;;  %v1924_v18 = vld [vmem:[%s436_s17] sm:$0xff]   ;;  %s1608_s20 = sshll.u32 %s3387_s19, 3 }
  0xe3   : > { %929 = vst [vmem:[#allocation2 + $0x89] sm:$0x1] %v2209_v0  ;;  %930 = vst [vmem:[#allocation2 + $0xa1] sm:$0x1] %v2209_v0  ;;  %s1609_s15 = sadd.s32 4294967295, %s1608_s20  ;;  %v637_v20 = vshrl.u32 %v636_v19, 7 }
  0xe4   : > { %931 = vst [vmem:[#allocation2 + $0xb9] sm:$0x1] %v2209_v0  ;;  %932 = vst [vmem:[#allocation2 + $0xd1] sm:$0x1] %v2209_v0  ;;  %1686 = vmatpush3.bf16.msra.mxu0 %v1909_v3  ;;  %v638_v21 = vstv %s1609_s15  ;;  %v2211_v24 = vmov 0   ;;  %s3388_s18 = sld [smem:[#allocation34_spill]] }
  0xe5   : > { %933 = vst [vmem:[#allocation2 + $0xe9] sm:$0x1] %v2209_v0  ;;  %1706 = vmatpush3.bf16.msra.mxu1 %v1909_v3  ;;  %1687 = vmatprep.subr.bf16.mxu0 %v2209_v0  ;;  %v639_v22 = vadd.s32 %v638_v21, %v637_v20  ;;  %v646_v23 = vsub.s32 0, %v637_v20  ;;  %s1645_s3 = sadd.s32 8, %s1608_s20  ;;  %s3389_s22 = sld [smem:[#allocation35_spill]] }
  0xe6   : > { %1707 = vmatprep.subr.bf16.mxu1 %v1910_v4  ;;  %v900_v32 = vstv %s1645_s3  ;;  %s1597_s3 = sshll.u32 %s2640_s1, 7  ;;  %s3390_s21 = sld [smem:[#allocation36_spill]] }
  0xe7   : > { %vm640_vm1 = vcmp.ge.s32.totalorder %v639_v22, 0  ;;  %vm641_vm2 = vcmp.lt.s32.totalorder %v639_v22, 16  ;;  %v901_v42 = vadd.s32 %v900_v32, %v637_v20  ;;  %s2912_s12 = scalar_lea.vmem [#allocation11], %s1597_s3  ;;  %s3391_s30 = sld [smem:[#allocation21_spill]] }
  0xe8   : > { %1688 = vmatpush3.bf16.msra.mxu0 %v1910_v4  ;;  %vm642_vm3 = vmand %vm640_vm1, %vm641_vm2  ;;  %s1646_s8 = sshll.u32 %s3387_s19, 4  ;;  %s1368_s2 = sshll.u32 %s2912_s12, 4  ;;  %s3201_s2 = int_to_ptr.vmem [resolvable:$true] %s1368_s2 }
  0xe9   : > { %1708 = vmatpush3.bf16.msra.mxu1 %v1910_v4  ;;  %1689 = vmatprep.subr.bf16.mxu0 %v2209_v0  ;;  %v643_v25 = vsel %vm642_vm3, 1, %v2211_v24  ;;  %vm902_vm5 = vcmp.lt.s32.totalorder %v901_v42, 16  ;;  %s3392_s11 = sld [smem:[#allocation27_spill]]  ;;  %s3393_s17 = sld [smem:[#allocation37_spill]] }
  0xea   : > { %1709 = vmatprep.subr.bf16.mxu1 %v1911_v6  ;;  %v647_v26 = vrot.slane %v643_v25, %v646_v23  ;;  %v2717_v27 = vld [vmem:[%s3388_s18] ss:$0 sm:$0xff]  ;;  %v903_v57 = vsel %vm902_vm5, 1, %v2211_v24  ;;  %s1351_s15 = scalar_lea.sflag [#allocation5], %s2640_s1  ;;  %s2043_s7 = scalar_lea.vmem %s3201_s2, 2048 }
  0xeb   : > { %v2730_v46 = vld [vmem:[%s3389_s22] ss:$0 sm:$0xff]  ;;  %v2735_v48 = vld [vmem:[%s3389_s22 + $0x3] ss:$0 sm:$0xff]  ;;  %v2740_v49 = vld [vmem:[%s3389_s22 + $0x6] ss:$0 sm:$0xff]  ;;  %p2044_p7 = scmp.ne.s32.totalorder %s3201_s2, %s2043_s7 }
  0xec   : > { %1690 = vmatpush3.bf16.msra.mxu0 %v1911_v6  ;;  %vm648_vm4 = vcmp.eq.s32.totalorder %v647_v26, 1  ;;  %v2748_v53 = vld [vmem:[%s3389_s22 + $0x1] ss:$0 sm:$0xff]  ;;  %v2759_v59 = vld [vmem:[%s3389_s22 + $0x4] ss:$0 sm:$0xff]  ;;  %s2212_s4 = smov [#allocation11]  }
  0xed   : > { %1710 = vmatpush3.bf16.msra.mxu1 %v1911_v6  ;;  %1691 = vmatprep.subr.bf16.mxu0 %v2209_v0  ;;  %v2764_v60 = vld [vmem:[%s3389_s22 + $0x7] ss:$0 sm:$0xff]  ;;  %s1633_s6 = sshll.u32 %s3391_s30, 5  ;;  %s2047_s18 = sshll.u32 %s2212_s4, 4  ;;  %s2048_s18 = int_to_ptr.vmem [resolvable:$false] %s2047_s18 }
  0xee   : > { %1711 = vmatprep.subr.bf16.mxu1 %v1912_v7  ;;  %s1365_s19 = sadd.s32 %s1646_s8, %s1633_s6  ;;  %s2049_s3 = scalar_lea.vmem %s2048_s18, 4096 }
  0xef   : > { %s1634_s24 = sshll.u32 %s1365_s19, 7  ;;  %p3394_p11 = scmp.ne.s32.totalorder %s3392_s11, 0 }
  0xf0   : > { %1692 = vmatpush3.bf16.msra.mxu0 %v1912_v7  ;;  %s3207_s20 = scalar_lea.hbm %s3393_s17, %s1634_s24  ;;  %p2050_p0 = scmp.lt.s32.totalorder %s3201_s2, %s2048_s18 }
  0xf1   : > { %1712 = vmatpush3.bf16.msra.mxu1 %v1912_v7  ;;  %1693 = vmatprep.subr.bf16.mxu0 %v2209_v0  ;;  %p2045_p2 = pnand %p2044_p7, %p3394_p11  ;;  %p2051_p10 = scmp.lt.s32.totalorder %s2049_s3, %s2043_s7 }
  0xf2   : > { %1713 = vmatprep.subr.bf16.mxu1 %v1913_v8 }
  0xf3   : > { %p2046_p6 = pneg %p2045_p2  ;;  %p2052_p12 = por %p2051_p10, %p2050_p0 }
  0xf4   : > { %1694 = vmatpush3.bf16.msra.mxu0 %v1913_v8 }
  0xf5   : > { %1714 = vmatpush3.bf16.msra.mxu1 %v1913_v8  ;;  %1695 = vmatprep.subr.bf16.mxu0 %v2209_v0  ;;  %p2053_p8 = pnand %p2052_p12, %p2046_p6 }
  0xf6   : > { %1715 = vmatprep.subr.bf16.mxu1 %v1914_v9 }
  0xf8   : > { %1696 = vmatpush3.bf16.msra.mxu0 %v1914_v9 }
  0xf9   : > { %1716 = vmatpush3.bf16.msra.mxu1 %v1914_v9  ;;  %1733 = vmatprep.subr.bf16.mxu0 %v2209_v0 }
  0xfb   : > { %1698 = vmatmul.mubr.bf16.vlgmr.msra.gmra.mrb[0].mxu0 %v1915_v10 }
  0xfc   : > { %1718 = vmatmul.mubr.bf16.vlgmr.msra.gmra.mrb[0].mxu1 %v1917_v11  ;;  %1734 = vmatpush3.bf16.msra.mxu0 %v1907_v1 }
  0xfd   : > { %1735 = vmatprep.subr.bf16.mxu0 %v2209_v0  ;;  %1721 = vmatprep.mubr.bf16.mxu1 %v1918_v12 }
  0xfe   : > { %1749 = vmatprep.mubr.msk.bf16.mxu0 %vm2210_vm0, %v2209_v0 }
 0x100   : > { %1736 = vmatpush3.bf16.msra.mxu0 %v1908_v2 }
 0x101   : > { %1737 = vmatprep.subr.bf16.mxu0 %v2209_v0 }
 0x104   : > { %1722 = vmatmul.mubr.bf16.gmra.mrb[4].mxu1 %v1919_v13  ;;  %1738 = vmatpush3.bf16.msra.mxu0 %v1909_v3  ;;  %v2771_v3 = vrot.slane %v903_v57, %v646_v23 }
 0x105   : > { %1739 = vmatprep.subr.bf16.mxu0 %v2209_v0  ;;  %1725 = vmatprep.mubr.bf16.mxu1 %v1920_v14 }
 0x106   : > { %vm908_vm6 = vcmp.eq.s32.totalorder %v2771_v3, 1 }
 0x108   : > { %1740 = vmatpush3.bf16.msra.mxu0 %v1910_v4 }
 0x109   : > { %1741 = vmatprep.subr.bf16.mxu0 %v2209_v0 }
 0x10c   : > { %1726 = vmatmul.mubr.bf16.gmra.mrb[8].mxu1 %v1921_v15  ;;  %1742 = vmatpush3.bf16.msra.mxu0 %v1911_v6  ;;  %v2787_v15 = vld [vmem:[%s3389_s22 + $0x2] ss:$0 sm:$0xff] }
 0x10d   : > { %1743 = vmatprep.subr.bf16.mxu0 %v2209_v0  ;;  %1729 = vmatprep.mubr.bf16.mxu1 %v1922_v16 }
 0x110   : > { %1744 = vmatpush3.bf16.msra.mxu0 %v1912_v7 }
 0x111   : > { %1745 = vmatprep.subr.bf16.mxu0 %v2209_v0 }
 0x114   : > { %1730 = vmatmul.mubr.bf16.gmra.mrb[12].mxu1 %v1923_v17  ;;  %1746 = vmatpush3.bf16.msra.mxu0 %v1913_v8 }
 0x115   : > { %1747 = vmatprep.subr.bf16.mxu0 %v2209_v0 }
 0x118   : > { %1748 = vmatpush3.bf16.msra.mxu0 %v1914_v9 }
 0x11b   : > { %1750 = vmatmul.mubr.bf16.vlgmr.msra.gmra.mrb[4].mxu0 %v1924_v18 }
 0x1ce   : > { %v619_v28 = vpop.f32.mrb[0].mxu0 }
 0x1cf   : > { %v632_v29 = vadd.f32 %v2717_v27, %v619_v28  ;;  %v1699_v30 = vpop.f32.mrb[1].mxu0  ;;  %v1719_v31 = vpop.f32.mrb[0].mxu1 }
 0x1d0   : > { %v816_v33 = vadd.f32 %v1719_v31, %v2717_v27  ;;  %v622_v34 = vpop.f32.mrb[2].mxu0  ;;  %v751_v35 = vpop.f32.mrb[1].mxu1 }
 0x1d1   : > { %v649_v36 = vsel %vm648_vm4, %v632_v29, 0.0  ;;  %v633_v37 = vadd.f32 %v2717_v27, %v622_v34  ;;  %v814_v38 = vadd.f32 %v2717_v27, %v751_v35  ;;  %v1700_v39 = vpop.f32.mrb[3].mxu0  ;;  %v1720_v40 = vpop.f32.mrb[2].mxu1 }
 0x1d2   : > { %651 = vst [vmem:[#allocation2 + $0x1] sm:$0xff] %v649_v36  ;;  %833 = vst [vmem:[#allocation2 + $0x31] sm:$0xff] %v816_v33  ;;  %v754_v41 = vpop.f32.mrb[3].mxu1  ;;  %v817_v44 = vadd.f32 %v1720_v40, %v2717_v27  ;;  %v1074_v2 = vmul.f32 %v2748_v53, %v649_v36  ;;  %v2774_v4 = vmul.f32 %v2748_v53, %v816_v33 }
 0x1d3   : > { %v650_v43 = vsel %vm648_vm4, %v633_v37, 0.0  ;;  %831 = vst [vmem:[#allocation2 + $0x19] sm:$0xff] %v814_v38  ;;  %v815_v45 = vadd.f32 %v2717_v27, %v754_v41  ;;  %v2777_v5 = vmul.f32 %v2759_v59, %v816_v33  ;;  %v1148_v6 = vmul.f32 %v2764_v60, %v816_v33 }
 0x1d4   : > { %652 = vst [vmem:[#allocation2 + $0x9] sm:$0xff] %v650_v43  ;;  %834 = vst [vmem:[#allocation2 + $0x39] sm:$0xff] %v817_v44  ;;  %v1075_v11 = vmul.f32 %v2748_v53, %v650_v43  ;;  %v1076_v12 = vmul.f32 %v2748_v53, %v814_v38  ;;  %v1111_v13 = vmul.f32 %v2759_v59, %v814_v38 }
 0x1d5   : > { %832 = vst [vmem:[#allocation2 + $0x21] sm:$0xff] %v815_v45  ;;  %v2790_v17 = vmul.f32 %v2748_v53, %v817_v44  ;;  %v2793_v18 = vmul.f32 %v2759_v59, %v817_v44  ;;  %v1149_v19 = vmul.f32 %v2764_v60, %v817_v44  ;;  %v2804_v30 = vmul.f32 %v2748_v53, %v815_v45 }
 0x1d6   : > { %v1112_v31 = vmul.f32 %v2759_v59, %v815_v45  ;;  %v2825_v45 = vld [vmem:[%s3389_s22 + $0x5] ss:$0 sm:$0xff] }
 0x1d7   : > { %v1723_v47 = vpop.f32.mrb[4].mxu1 }
 0x1d8   : > { %v2743_v50 = vadd.f32 %v1723_v47, %v2717_v27  ;;  %v767_v51 = vpop.f32.mrb[5].mxu1 }
 0x1d9   : > { %v934_v52 = vld [vmem:[#allocation2] sm:$0xff]  ;;  %v938_v54 = vld [vmem:[#allocation2 + $0x30] sm:$0xff]  ;;  %v2751_v55 = vadd.f32 %v2717_v27, %v767_v51  ;;  %v2753_v56 = vpop.f32.mrb[6].mxu1 }
 0x1da   : > { %v959_v58 = vmul.f32 %v2730_v46, %v934_v52  ;;  %v936_v61 = vld [vmem:[#allocation2 + $0x18] sm:$0xff]  ;;  %837 = vst [vmem:[#allocation2 + $0x61] sm:$0xff] %v2743_v50  ;;  %v770_v62 = vpop.f32.mrb[7].mxu1  ;;  %v1017_v63 = vmul.f32 %v2740_v49, %v938_v54  ;;  %v982_v21 = vmul.f32 %v2735_v48, %v938_v54  ;;  %v963_v28 = vmul.f32 %v2730_v46, %v938_v54 }
 0x1db   : > { %v935_v0 = vld [vmem:[#allocation2 + $0x8] sm:$0xff]  ;;  %v980_v1 = vmul.f32 %v2735_v48, %v936_v61  ;;  %835 = vst [vmem:[#allocation2 + $0x49] sm:$0xff] %v2751_v55  ;;  %v939_v8 = vld [vmem:[#allocation2 + $0x38] sm:$0xff]  ;;  %v961_v23 = vmul.f32 %v2730_v46, %v936_v61  ;;  %v2812_v36 = vmul.f32 %v2748_v53, %v2743_v50  ;;  %v2816_v37 = vmul.f32 %v2759_v59, %v2743_v50 }
 0x1dc   : > { %v937_v9 = vld [vmem:[#allocation2 + $0x20] sm:$0xff]  ;;  %v960_v10 = vmul.f32 %v2730_v46, %v935_v0  ;;  %v1181_v22 = vld [vmem:[#allocation2 + $0xa] sm:$0xff]  ;;  %v1018_v24 = vmul.f32 %v2740_v49, %v939_v8  ;;  %v1152_v52 = vmul.f32 %v2764_v60, %v2743_v50  ;;  %v1184_v61 = vld [vmem:[#allocation2 + $0x32] sm:$0xff] }
 0x1dd   : > { %v996_v7 = vadd.f32 %v980_v1, %v959_v58  ;;  %v1180_v14 = vld [vmem:[#allocation2 + $0x2] sm:$0xff]  ;;  %v981_v25 = vmul.f32 %v2735_v48, %v937_v9  ;;  %v1206_v40 = vmul.f32 %v2787_v15, %v1181_v22  ;;  %v998_v44 = vadd.f32 %v982_v21, %v961_v23  ;;  %v1182_v51 = vld [vmem:[#allocation2 + $0x1a] sm:$0xff] }
 0x1de   : > { %v1205_v34 = vmul.f32 %v2787_v15, %v1180_v14  ;;  %v2831_v58 = vmul.f32 %v2730_v46, %v939_v8  ;;  %v2840_v1 = vadd.f32 %v2753_v56, %v2717_v27  ;;  %v962_v22 = vmul.f32 %v2730_v46, %v937_v9  ;;  %v1185_v9 = vld [vmem:[#allocation2 + $0x3a] sm:$0xff] }
 0x1df   : > { %v1033_v16 = vadd.f32 %v1017_v63, %v996_v7  ;;  %v1727_v20 = vpop.f32.mrb[8].mxu1  ;;  %v997_v35 = vadd.f32 %v981_v25, %v960_v10  ;;  %v2836_v63 = vld [vmem:[%s3389_s22 + $0x8] ss:$0 sm:$0xff] }
 0x1e0   : > { %v2800_v26 = vpop.f32.mrb[9].mxu1  ;;  %v1183_v7 = vld [vmem:[#allocation2 + $0x22] sm:$0xff]  ;;  %v2846_v10 = vadd.f32 %v1727_v20, %v2717_v27  ;;  %838 = vst [vmem:[#allocation2 + $0x69] sm:$0xff] %v2840_v1 }
 0x1e1   : > { %v1090_v29 = vadd.f32 %v1074_v2, %v1033_v16  ;;  %v2807_v32 = vld [vmem:[#allocation2 + $0x60] sm:$0xff]  ;;  %v1728_v33 = vpop.f32.mrb[10].mxu1  ;;  %v1034_v47 = vadd.f32 %v1018_v24, %v997_v35  ;;  %v1242_v16 = vmul.f32 %v2825_v45, %v1182_v51 }
 0x1e2   : > { %v940_v38 = vld [vmem:[#allocation2 + $0x48] sm:$0xff]  ;;  %v786_v39 = vpop.f32.mrb[11].mxu1  ;;  %v1021_v42 = vmul.f32 %v2740_v49, %v2807_v32  ;;  %841 = vst [vmem:[#allocation2 + $0x91] sm:$0xff] %v2846_v10 }
 0x1e3   : > { %v1127_v41 = vadd.f32 %v1111_v13, %v1090_v29  ;;  %v984_v43 = vmul.f32 %v2735_v48, %v940_v38  ;;  %v1019_v54 = vmul.f32 %v2740_v49, %v940_v38  ;;  %v1091_v2 = vadd.f32 %v1075_v11, %v1034_v47 }
 0x1e4   : > { %v983_v13 = vmul.f32 %v2735_v48, %v939_v8  ;;  %v1279_v11 = vmul.f32 %v2836_v63, %v1184_v61  ;;  %v1243_v8 = vmul.f32 %v2825_v45, %v1183_v7 }
 0x1e5   : > { %v1164_v57 = vadd.f32 %v1148_v6, %v1127_v41  ;;  %v1000_v0 = vadd.f32 %v984_v43, %v963_v28  ;;  %v1035_v50 = vadd.f32 %v1019_v54, %v998_v44  ;;  %v2843_v6 = vadd.f32 %v2717_v27, %v770_v62 }
 0x1e6   : > { %v1128_v23 = vadd.f32 %v1112_v31, %v1091_v2  ;;  %v1115_v28 = vmul.f32 %v2759_v59, %v2751_v55  ;;  %v965_v43 = vmul.f32 %v2730_v46, %v940_v38  ;;  %v2891_v2 = vmul.f32 %v2787_v15, %v1185_v9 }
 0x1e7   : > { %v1221_v14 = vadd.f32 %v1205_v34, %v1164_v57  ;;  %v1037_v21 = vadd.f32 %v1021_v42, %v1000_v0  ;;  %v2851_v56 = vpop.f32.mrb[12].mxu1  ;;  %v1092_v62 = vadd.f32 %v1076_v12, %v1035_v50  ;;  %836 = vst [vmem:[#allocation2 + $0x51] sm:$0xff] %v2843_v6  ;;  %v2869_v12 = vld [vmem:[%s3390_s21] ss:$0 sm:$0xff]  ;;  %v986_v34 = vmul.f32 %v2735_v48, %v2807_v32 }
 0x1e8   : > { %v2857_v20 = vpop.f32.mrb[13].mxu1  ;;  %v1165_v31 = vadd.f32 %v1149_v19, %v1128_v23  ;;  %v2881_v19 = vadd.f32 %v2717_v27, %v2800_v26  ;;  %v2884_v57 = vadd.f32 %v1728_v33, %v2717_v27  ;;  %v1209_v0 = vmul.f32 %v2787_v15, %v1184_v61 }
 0x1e9   : > { %v1258_v24 = vadd.f32 %v1242_v16, %v1221_v14  ;;  %v1094_v25 = vadd.f32 %v2774_v4, %v1037_v21  ;;  %v2864_v29 = vpop.f32.mrb[14].mxu1  ;;  %v1129_v35 = vadd.f32 %v2777_v5, %v1092_v62  ;;  %v1150_v4 = vmul.f32 %v2764_v60, %v2751_v55 }
 0x1ea   : > { %v2876_v41 = vpop.f32.mrb[15].mxu1  ;;  %v1222_v47 = vadd.f32 %v1206_v40, %v1165_v31  ;;  %v2887_v5 = vadd.f32 %v2717_v27, %v786_v39  ;;  %839 = vst [vmem:[#allocation2 + $0x79] sm:$0xff] %v2881_v19  ;;  %v1244_v26 = vmul.f32 %v2825_v45, %v1184_v61  ;;  %v1280_v40 = vmul.f32 %v2836_v63, %v1185_v9  ;;  %v2898_v39 = vld [vmem:[#allocation2 + $0x68] sm:$0xff] }
 0x1eb   : > { %v1295_v42 = vadd.f32 %v1279_v11, %v1258_v24  ;;  %v1131_v44 = vadd.f32 %v1115_v28, %v1094_v25  ;;  %v1166_v54 = vadd.f32 %v1150_v4, %v1129_v35  ;;  %v1207_v33 = vmul.f32 %v2787_v15, %v1182_v51  ;;  %842 = vst [vmem:[#allocation2 + $0x99] sm:$0xff] %v2884_v57  ;;  %v2939_v35 = vld [vmem:[#allocation2 + $0x62] sm:$0xff] }
 0x1ec   : > { %v1259_v14 = vadd.f32 %v1243_v8, %v1222_v47  ;;  %840 = vst [vmem:[#allocation2 + $0x81] sm:$0xff] %v2887_v5  ;;  %v2905_v21 = vmul.f32 %v2825_v45, %v1185_v9  ;;  %v2908_v11 = vmul.f32 %v2787_v15, %v1183_v7  ;;  %v2917_v51 = vmul.f32 %v2748_v53, %v2751_v55 }
 0x1ed   : > { %v1318_v38 = vadd.f32 %v2869_v12, %v1295_v42  ;;  %v1168_v50 = vadd.f32 %v1152_v52, %v1131_v44  ;;  %v999_v52 = vadd.f32 %v983_v13, %v962_v22  ;;  %v967_v8 = vmul.f32 %v2730_v46, %v2807_v32 }
 0x1ee   : > { %v2902_v16 = vpop.f32.mrb[4].mxu0  ;;  %v941_v61 = vld [vmem:[#allocation2 + $0x50] sm:$0xff]  ;;  %v1296_v62 = vadd.f32 %v1280_v40, %v1259_v14  ;;  %v1002_v24 = vadd.f32 %v986_v34, %v965_v43  ;;  %v1223_v13 = vadd.f32 %v1207_v33, %v1166_v54  ;;  %v1022_v25 = vmul.f32 %v2740_v49, %v2898_v39 }
 0x1ef   : > { %1334 = vst [vmem:[%s2912_s12] sm:$0xff] %v1318_v38  ;;  %v1751_v23 = vpop.f32.mrb[5].mxu0  ;;  %v2921_v22 = vld [vmem:[#allocation2 + $0x4a] sm:$0xff]  ;;  %v2929_v55 = vmul.f32 %v2748_v53, %v2840_v1  ;;  %v2933_v28 = vmul.f32 %v2759_v59, %v2840_v1  ;;  %v985_v32 = vmul.f32 %v2735_v48, %v941_v61  ;;  %v1153_v34 = vmul.f32 %v2764_v60, %v2840_v1 }
 0x1f0   : > { %v2923_v7 = vpop.f32.mrb[6].mxu0  ;;  %v1319_v31 = vadd.f32 %v2869_v12, %v1296_v62  ;;  %v1020_v4 = vmul.f32 %v2740_v49, %v941_v61  ;;  %v2944_v42 = vmul.f32 %v2748_v53, %v2843_v6  ;;  %v1116_v44 = vmul.f32 %v2759_v59, %v2843_v6  ;;  %v2956_v14 = vld [vmem:[#allocation2 + $0x90] sm:$0xff] }
 0x1f1   : > { %v1752_v9 = vpop.f32.mrb[7].mxu0  ;;  %v1001_v43 = vadd.f32 %v985_v32, %v2831_v58  ;;  %v1225_v47 = vadd.f32 %v1209_v0, %v1168_v50  ;;  %v1246_v54 = vmul.f32 %v2825_v45, %v2921_v22  ;;  %v1151_v1 = vmul.f32 %v2764_v60, %v2843_v6  ;;  %v2958_v23 = vld [vmem:[#allocation2 + $0x78] sm:$0xff] }
 0x1f2   : > { %1335 = vst [vmem:[%s2912_s12 + $0x8] sm:$0xff] %v1319_v31  ;;  %v1036_v38 = vadd.f32 %v1020_v4, %v999_v52  ;;  %v1260_v40 = vadd.f32 %v1244_v26, %v1223_v13  ;;  %v1281_v33 = vmul.f32 %v2836_v63, %v2921_v22  ;;  %v1283_v58 = vmul.f32 %v2836_v63, %v2939_v35 }
 0x1f3   : > { %v1038_v0 = vadd.f32 %v1022_v25, %v1001_v43  ;;  %v1262_v50 = vadd.f32 %v1246_v54, %v1225_v47  ;;  %v2964_v62 = vmul.f32 %v2748_v53, %v2846_v10  ;;  %v2969_v26 = vmul.f32 %v2759_v59, %v2846_v10 }
 0x1f4   : > { %v1093_v52 = vadd.f32 %v2804_v30, %v1036_v38  ;;  %v1297_v6 = vadd.f32 %v1281_v33, %v1260_v40  ;;  %v1156_v13 = vmul.f32 %v2764_v60, %v2846_v10  ;;  %v1025_v25 = vmul.f32 %v2740_v49, %v2956_v14  ;;  %v1189_v40 = vld [vmem:[#allocation2 + $0x6a] sm:$0xff] }
 0x1f5   : > { %v1095_v32 = vadd.f32 %v2790_v17, %v1038_v0  ;;  %v1299_v9 = vadd.f32 %v1283_v58, %v1262_v50  ;;  %v988_v31 = vmul.f32 %v2735_v48, %v2958_v23  ;;  %v1023_v43 = vmul.f32 %v2740_v49, %v2958_v23 }
 0x1f6   : > { %v1130_v30 = vadd.f32 %v2793_v18, %v1093_v52  ;;  %v1320_v4 = vadd.f32 %v2869_v12, %v1297_v6  ;;  %v2984_v10 = vmul.f32 %v2748_v53, %v2881_v19  ;;  %v1119_v38 = vmul.f32 %v2759_v59, %v2881_v19  ;;  %v2989_v18 = vld [vmem:[#allocation2 + $0x52] sm:$0xff] }
 0x1f7   : > { %v1132_v17 = vadd.f32 %v1116_v44, %v1095_v32  ;;  %v1322_v47 = vadd.f32 %v2869_v12, %v1299_v9  ;;  %v1004_v54 = vadd.f32 %v988_v31, %v967_v8  ;;  %v1039_v58 = vadd.f32 %v1023_v43, %v1002_v24  ;;  %v3008_v9 = vld [vmem:[#allocation2 + $0x98] sm:$0xff]  ;;  %v3010_v31 = vld [vmem:[#allocation2 + $0x80] sm:$0xff] }
 0x1f8   : > { %v1167_v33 = vadd.f32 %v1151_v1, %v1130_v30  ;;  %1336 = vst [vmem:[%s2912_s12 + $0x10] sm:$0xff] %v1320_v4  ;;  %v1154_v0 = vmul.f32 %v2764_v60, %v2881_v19  ;;  %v2996_v50 = vmul.f32 %v2748_v53, %v2884_v57  ;;  %v968_v44 = vmul.f32 %v2730_v46, %v2898_v39 }
 0x1f9   : > { %v987_v8 = vmul.f32 %v2735_v48, %v2898_v39  ;;  %v1169_v52 = vadd.f32 %v1153_v34, %v1132_v17  ;;  %1338 = vst [vmem:[%s2912_s12 + $0x20] sm:$0xff] %v1322_v47  ;;  %v1041_v1 = vadd.f32 %v1025_v25, %v1004_v54  ;;  %v1213_v6 = vmul.f32 %v2787_v15, %v2939_v35 }
 0x1fa   : > { %v966_v24 = vmul.f32 %v2730_v46, %v941_v61  ;;  %v1224_v19 = vadd.f32 %v2908_v11, %v1167_v33  ;;  %v1096_v32 = vadd.f32 %v2917_v51, %v1039_v58  ;;  %v1284_v30 = vmul.f32 %v2836_v63, %v1189_v40 }
 0x1fb   : > { %v1226_v39 = vadd.f32 %v2891_v2, %v1169_v52  ;;  %v1247_v34 = vmul.f32 %v2825_v45, %v2989_v18  ;;  %v1098_v25 = vadd.f32 %v2812_v36, %v1041_v1  ;;  %v1211_v61 = vmul.f32 %v2787_v15, %v2921_v22  ;;  %v3032_v1 = vld [vmem:[#allocation2 + $0x7a] sm:$0xff] }
 0x1fc   : > { %v1261_v11 = vadd.f32 %v2905_v21, %v1224_v19  ;;  %v1282_v51 = vmul.f32 %v2836_v63, %v2989_v18  ;;  %v1133_v4 = vadd.f32 %v2816_v37, %v1096_v32  ;;  %v1026_v2 = vmul.f32 %v2740_v49, %v3008_v9  ;;  %v3030_v37 = vld [vmem:[#allocation2 + $0x92] sm:$0xff] }
 0x1fd   : > { %v1263_v43 = vadd.f32 %v1247_v34, %v1226_v39  ;;  %v1135_v17 = vadd.f32 %v1119_v38, %v1098_v25  ;;  %v989_v47 = vmul.f32 %v2735_v48, %v3010_v31  ;;  %v1003_v54 = vadd.f32 %v987_v8, %v966_v24 }
 0x1fe   : > { %v1298_v36 = vadd.f32 %v1282_v51, %v1261_v11  ;;  %v1170_v33 = vadd.f32 %v1154_v0, %v1133_v4  ;;  %v1024_v22 = vmul.f32 %v2740_v49, %v3010_v31  ;;  %v1214_v21 = vmul.f32 %v2787_v15, %v1189_v40 }
 0x1ff   : > { %v1300_v58 = vadd.f32 %v1284_v30, %v1263_v43  ;;  %v1172_v52 = vadd.f32 %v1156_v13, %v1135_v17  ;;  %v1005_v38 = vadd.f32 %v989_v47, %v968_v44  ;;  %v1248_v19 = vmul.f32 %v2825_v45, %v2939_v35 }
 0x200   : > { %v1321_v8 = vadd.f32 %v2869_v12, %v1298_v36  ;;  %v1227_v0 = vadd.f32 %v1211_v61, %v1170_v33  ;;  %v1040_v24 = vadd.f32 %v1024_v22, %v1003_v54  ;;  %v1249_v32 = vmul.f32 %v2825_v45, %v1189_v40  ;;  %v1191_v33 = vld [vmem:[#allocation2 + $0x82] sm:$0xff] }
 0x201   : > { %v1323_v39 = vadd.f32 %v2869_v12, %v1300_v58  ;;  %v1157_v13 = vmul.f32 %v2764_v60, %v2884_v57  ;;  %v1042_v30 = vadd.f32 %v1026_v2, %v1005_v38  ;;  %v1287_v44 = vmul.f32 %v2836_v63, %v3030_v37  ;;  %v1193_v38 = vld [vmem:[#allocation2 + $0x9a] sm:$0xff] }
 0x202   : > { %1337 = vst [vmem:[%s2912_s12 + $0x18] sm:$0xff] %v1321_v8  ;;  %v1097_v35 = vadd.f32 %v2944_v42, %v1040_v24  ;;  %v1229_v34 = vadd.f32 %v1213_v6, %v1172_v52  ;;  %v1250_v25 = vmul.f32 %v2825_v45, %v3032_v1  ;;  %v1120_v61 = vmul.f32 %v2759_v59, %v2887_v5 }
 0x203   : > { %1339 = vst [vmem:[%s2912_s12 + $0x28] sm:$0xff] %v1323_v39  ;;  %v1099_v40 = vadd.f32 %v2929_v55, %v1042_v30  ;;  %v1264_v11 = vadd.f32 %v1248_v19, %v1227_v0  ;;  %v1285_v51 = vmul.f32 %v2836_v63, %v3032_v1  ;;  %v1155_v43 = vmul.f32 %v2764_v60, %v2887_v5 }
 0x204   : > { %v1134_v4 = vadd.f32 %v2933_v28, %v1097_v35  ;;  %v1266_v42 = vadd.f32 %v1250_v25, %v1229_v34  ;;  %v828_v6 = vadd.f32 %v2851_v56, %v2717_v27  ;;  %v3061_v55 = vadd.f32 %v2717_v27, %v2857_v20 }
 0x205   : > { %v1136_v17 = vadd.f32 %v1120_v61, %v1099_v40  ;;  %v1301_v2 = vadd.f32 %v1285_v51, %v1264_v11  ;;  %v3065_v47 = vadd.f32 %v2864_v29, %v2717_v27  ;;  %v1212_v28 = vmul.f32 %v2787_v15, %v2989_v18 }
 0x206   : > { %v971_v54 = vmul.f32 %v2730_v46, %v2956_v14  ;;  %v1171_v36 = vadd.f32 %v1155_v43, %v1134_v4  ;;  %v1303_v56 = vadd.f32 %v1287_v44, %v1266_v42  ;;  %845 = vst [vmem:[#allocation2 + $0xc1] sm:$0xff] %v828_v6  ;;  %v990_v22 = vmul.f32 %v2735_v48, %v2956_v14 }
 0x207   : > { %v969_v20 = vmul.f32 %v2730_v46, %v2958_v23  ;;  %v1173_v58 = vadd.f32 %v1157_v13, %v1136_v17  ;;  %v1324_v29 = vadd.f32 %v2869_v12, %v1301_v2  ;;  %843 = vst [vmem:[#allocation2 + $0xa9] sm:$0xff] %v3061_v55  ;;  %846 = vst [vmem:[#allocation2 + $0xc9] sm:$0xff] %v3065_v47 }
 0x208   : > { %v3080_v18 = vmul.f32 %v2730_v46, %v3008_v9  ;;  %v991_v52 = vmul.f32 %v2735_v48, %v3008_v9  ;;  %v1228_v14 = vadd.f32 %v1212_v28, %v1171_v36  ;;  %v1326_v19 = vadd.f32 %v2869_v12, %v1303_v56 }
 0x209   : > { %v1230_v23 = vadd.f32 %v1214_v21, %v1173_v58  ;;  %v1251_v8 = vmul.f32 %v2825_v45, %v1191_v33  ;;  %1340 = vst [vmem:[%s2912_s12 + $0x30] sm:$0xff] %v1324_v29  ;;  %v3089_v0 = vadd.f32 %v2717_v27, %v2876_v41  ;;  %v896_v24 = vadd.f32 %v2717_v27, %v2902_v16 }
 0x20a   : > { %v970_v39 = vmul.f32 %v2730_v46, %v3010_v31  ;;  %v1265_v13 = vadd.f32 %v1249_v32, %v1228_v14  ;;  %v1286_v9 = vmul.f32 %v2836_v63, %v1191_v33  ;;  %1342 = vst [vmem:[%s2912_s12 + $0x40] sm:$0xff] %v1326_v19  ;;  %v897_v21 = vadd.f32 %v2717_v27, %v2923_v7 }
 0x20b   : > { %v1006_v30 = vadd.f32 %v990_v22, %v969_v20  ;;  %v3101_v44 = vmul.f32 %v2759_v59, %v2884_v57  ;;  %v1288_v41 = vmul.f32 %v2836_v63, %v1193_v38  ;;  %v1267_v35 = vadd.f32 %v1251_v8, %v1230_v23  ;;  %844 = vst [vmem:[#allocation2 + $0xb1] sm:$0xff] %v3089_v0 }
 0x20c   : > { %v3107_v16 = vmul.f32 %v2787_v15, %v3030_v37  ;;  %v1302_v31 = vadd.f32 %v1286_v9, %v1265_v13  ;;  %v909_v32 = vsel %vm908_vm6, %v896_v24, 0.0  ;;  %v910_v27 = vsel %vm908_vm6, %v897_v21, 0.0 }
 0x20d   : > { %v3114_v7 = vmul.f32 %v2787_v15, %v1193_v38  ;;  %v3118_v57 = vmul.f32 %v2825_v45, %v3030_v37  ;;  %v3121_v34 = vmul.f32 %v2825_v45, %v1193_v38  ;;  %v1304_v25 = vadd.f32 %v1288_v41, %v1267_v35  ;;  %v950_v40 = vld [vmem:[#allocation2 + $0xc0] sm:$0xff]  ;;  %912 = vst [vmem:[#allocation2 + $0xd9] sm:$0xff] %v909_v32 }
 0x20e   : > { %913 = vst [vmem:[#allocation2 + $0xe1] sm:$0xff] %v910_v27  ;;  %v1007_v61 = vadd.f32 %v991_v52, %v970_v39  ;;  %v1085_v3 = vmul.f32 %v2748_v53, %v2887_v5  ;;  %v1215_v11 = vmul.f32 %v2787_v15, %v3032_v1  ;;  %v1325_v51 = vadd.f32 %v2869_v12, %v1302_v31  ;;  %v948_v37 = vld [vmem:[#allocation2 + $0xa8] sm:$0xff] }
 0x20f   : > { %v1327_v4 = vadd.f32 %v2869_v12, %v1304_v25  ;;  %v1029_v43 = vmul.f32 %v2740_v49, %v950_v40  ;;  %v992_v42 = vmul.f32 %v2735_v48, %v948_v37  ;;  %v1027_v17 = vmul.f32 %v2740_v49, %v948_v37  ;;  %v951_v36 = vld [vmem:[#allocation2 + $0xc8] sm:$0xff] }
 0x210   : > { %v3133_v2 = vmul.f32 %v2787_v15, %v1191_v33  ;;  %1341 = vst [vmem:[%s2912_s12 + $0x38] sm:$0xff] %v1325_v51  ;;  %v1125_v5 = vmul.f32 %v2759_v59, %v828_v6  ;;  %v1160_v28 = vmul.f32 %v2764_v60, %v828_v6  ;;  %v1088_v1 = vmul.f32 %v2748_v53, %v3061_v55 }
 0x211   : > { %1343 = vst [vmem:[%s2912_s12 + $0x48] sm:$0xff] %v1327_v4  ;;  %v994_v56 = vmul.f32 %v2735_v48, %v950_v40  ;;  %v973_v22 = vmul.f32 %v2730_v46, %v948_v37  ;;  %v1008_v20 = vadd.f32 %v992_v42, %v971_v54  ;;  %v1043_v58 = vadd.f32 %v1027_v17, %v1006_v30 }
 0x212   : > { %v1123_v33 = vmul.f32 %v2759_v59, %v3061_v55  ;;  %v1158_v29 = vmul.f32 %v2764_v60, %v3061_v55  ;;  %v1126_v6 = vmul.f32 %v2759_v59, %v3065_v47  ;;  %v1161_v52 = vmul.f32 %v2764_v60, %v3065_v47  ;;  %v949_v38 = vld [vmem:[#allocation2 + $0xb0] sm:$0xff] }
 0x213   : > { %v1045_v14 = vadd.f32 %v1029_v43, %v1008_v20  ;;  %v1100_v19 = vadd.f32 %v2984_v10, %v1043_v58  ;;  %v1030_v23 = vmul.f32 %v2740_v49, %v951_v36  ;;  %v993_v54 = vmul.f32 %v2735_v48, %v949_v38  ;;  %v1194_v40 = vld [vmem:[#allocation2 + $0xaa] sm:$0xff] }
 0x214   : > { %v995_v8 = vmul.f32 %v2735_v48, %v951_v36  ;;  %v974_v24 = vmul.f32 %v2730_v46, %v949_v38  ;;  %v1028_v55 = vmul.f32 %v2740_v49, %v949_v38  ;;  %v1089_v39 = vmul.f32 %v2748_v53, %v3089_v0  ;;  %v952_v13 = vld [vmem:[#allocation2 + $0xd8] sm:$0xff] }
 0x215   : > { %v1010_v9 = vadd.f32 %v994_v56, %v973_v22  ;;  %v1102_v47 = vadd.f32 %v2964_v62, %v1045_v14  ;;  %v1137_v21 = vadd.f32 %v2969_v26, %v1100_v19  ;;  %v1009_v10 = vadd.f32 %v993_v54, %v3080_v18  ;;  %v953_v30 = vld [vmem:[#allocation2 + $0xe0] sm:$0xff]  ;;  %v1195_v22 = vld [vmem:[#allocation2 + $0xb2] sm:$0xff] }
 0x216   : > { %v1044_v41 = vadd.f32 %v1028_v55, %v1007_v61  ;;  %v1124_v48 = vmul.f32 %v2759_v59, %v3089_v0  ;;  %v1159_v46 = vmul.f32 %v2764_v60, %v3089_v0  ;;  %v1162_v35 = vmul.f32 %v2764_v60, %v909_v32  ;;  %v1196_v59 = vld [vmem:[#allocation2 + $0xc2] sm:$0xff] }
 0x217   : > { %v1139_v31 = vadd.f32 %v1123_v33, %v1102_v47  ;;  %v1174_v53 = vadd.f32 %v1158_v29, %v1137_v21  ;;  %v1046_v25 = vadd.f32 %v1030_v23, %v1009_v10  ;;  %v1031_v62 = vmul.f32 %v2740_v49, %v952_v13  ;;  %v1197_v29 = vld [vmem:[#allocation2 + $0xca] sm:$0xff]  ;;  %v1199_v13 = vld [vmem:[#allocation2 + $0xe2] sm:$0xff] }
 0x218   : > { %v1011_v51 = vadd.f32 %v995_v8, %v974_v24  ;;  %v1101_v26 = vadd.f32 %v1085_v3, %v1044_v41  ;;  %v1032_v18 = vmul.f32 %v2740_v49, %v953_v30  ;;  %v1163_v61 = vmul.f32 %v2764_v60, %v910_v27  ;;  %v1198_v24 = vld [vmem:[#allocation2 + $0xda] sm:$0xff] }
 0x219   : > { %v1176_v37 = vadd.f32 %v1160_v28, %v1139_v31  ;;  %v1231_v4 = vadd.f32 %v1215_v11, %v1174_v53  ;;  %v1103_v43 = vadd.f32 %v2996_v50, %v1046_v25  ;;  %v1047_v0 = vadd.f32 %v1031_v62, %v1010_v9 }
 0x21a   : > { %v1138_v32 = vadd.f32 %v3101_v44, %v1101_v26  ;;  %v1254_v42 = vmul.f32 %v2825_v45, %v1194_v40  ;;  %v1289_v17 = vmul.f32 %v2836_v63, %v1194_v40  ;;  %v1048_v36 = vadd.f32 %v1032_v18, %v1011_v51 }
 0x21b   : > { %v1140_v56 = vadd.f32 %v1124_v48, %v1103_v43  ;;  %v1233_v3 = vadd.f32 %v3107_v16, %v1176_v37  ;;  %v1268_v49 = vadd.f32 %v3118_v57, %v1231_v4  ;;  %v1104_v60 = vadd.f32 %v1088_v1, %v1047_v0 }
 0x21c   : > { %v1256_v27 = vmul.f32 %v2825_v45, %v1196_v59  ;;  %v1291_v11 = vmul.f32 %v2836_v63, %v1196_v59  ;;  %v1175_v50 = vadd.f32 %v1159_v46, %v1138_v32  ;;  %v1105_v44 = vadd.f32 %v1089_v39, %v1048_v36 }
 0x21d   : > { %v1177_v28 = vadd.f32 %v1161_v52, %v1140_v56  ;;  %v1270_v20 = vadd.f32 %v1254_v42, %v1233_v3  ;;  %v1305_v58 = vadd.f32 %v1289_v17, %v1268_v49  ;;  %v1141_v33 = vadd.f32 %v1125_v5, %v1104_v60 }
 0x21e   : > { %v1219_v38 = vmul.f32 %v2787_v15, %v1194_v40  ;;  %v1232_v16 = vadd.f32 %v3133_v2, %v1175_v50  ;;  %v1255_v57 = vmul.f32 %v2825_v45, %v1195_v22  ;;  %v1142_v1 = vadd.f32 %v1126_v6, %v1105_v44 }
 0x21f   : > { %v1234_v14 = vadd.f32 %v3114_v7, %v1177_v28  ;;  %v1307_v19 = vadd.f32 %v1291_v11, %v1270_v20  ;;  %v1328_v23 = vadd.f32 %v2869_v12, %v1305_v58  ;;  %v1178_v54 = vadd.f32 %v1162_v35, %v1141_v33 }
 0x220   : > { %v1220_v52 = vmul.f32 %v2787_v15, %v1195_v22  ;;  %v1269_v5 = vadd.f32 %v3121_v34, %v1232_v16  ;;  %v1290_v8 = vmul.f32 %v2836_v63, %v1195_v22  ;;  %v1179_v2 = vadd.f32 %v1163_v61, %v1142_v1 }
 0x221   : > { %v1292_v55 = vmul.f32 %v2836_v63, %v1197_v29  ;;  %v1271_v6 = vadd.f32 %v1255_v57, %v1234_v14  ;;  %v1330_v7 = vadd.f32 %v2869_v12, %v1307_v19  ;;  %1344 = vst [vmem:[%s2912_s12 + $0x50] sm:$0xff] %v1328_v23  ;;  %v1235_v39 = vadd.f32 %v1219_v38, %v1178_v54 }
 0x222   : > { %v1257_v9 = vmul.f32 %v2825_v45, %v1197_v29  ;;  %v1306_v15 = vadd.f32 %v1290_v8, %v1269_v5  ;;  %v1236_v47 = vadd.f32 %v1220_v52, %v1179_v2  ;;  %v1293_v10 = vmul.f32 %v2836_v63, %v1198_v24 }
 0x223   : > { %v1308_v34 = vadd.f32 %v1292_v55, %v1271_v6  ;;  %1346 = vst [vmem:[%s2912_s12 + $0x60] sm:$0xff] %v1330_v7  ;;  %v1272_v21 = vadd.f32 %v1256_v27, %v1235_v39  ;;  %v1294_v48 = vmul.f32 %v2836_v63, %v1199_v13 }
 0x224   : > { %v1329_v30 = vadd.f32 %v2869_v12, %v1306_v15  ;;  %v1273_v41 = vadd.f32 %v1257_v9, %v1236_v47 }
 0x225   : > { %v1331_v45 = vadd.f32 %v2869_v12, %v1308_v34  ;;  %v1309_v46 = vadd.f32 %v1293_v10, %v1272_v21 }
 0x226   : > { %1345 = vst [vmem:[%s2912_s12 + $0x58] sm:$0xff] %v1329_v30  ;;  %v1310_v35 = vadd.f32 %v1294_v48, %v1273_v41 }
 0x227   : > { %1347 = vst [vmem:[%s2912_s12 + $0x68] sm:$0xff] %v1331_v45  ;;  %v1332_v31 = vadd.f32 %v2869_v12, %v1309_v46 }
 0x228   : > { %v1333_v53 = vadd.f32 %v2869_v12, %v1310_v35 }
 0x229   : > { %1348 = vst [vmem:[%s2912_s12 + $0x70] sm:$0xff] %v1332_v31 }
 0x22a   : > { %1349 = vst [vmem:[%s2912_s12 + $0x78] sm:$0xff] %v1333_v53 }
 0x22b   : > { %2056 = shalt.err (!%p2053_p8)
}
 0x22c   : > { %s2057_s16 = scalar_lea.hbm %s3207_s20, 2048  ;;  %s2061_s12 = scalar_lea.hbm %s3393_s17, 8192 }
 0x22d   : > { %p2058_p1 = scmp.ne.s32.totalorder %s3207_s20, %s2057_s16  ;;  %p2062_p3 = scmp.lt.u32.totalorder %s3207_s20, %s3393_s17 }
 0x22e   : > { %p2063_p13 = scmp.lt.u32.totalorder %s2061_s12, %s2057_s16  ;;  %p2065_p7 = scmp.lt.u32.totalorder %s2057_s16, %s3207_s20 }
 0x22f   : > { %p2059_p4 = pnand %p2058_p1, %p3394_p11 }
 0x230   : > { %p2064_p5 = por %p2063_p13, %p2062_p3 }
 0x231   : > { %p2060_p9 = pneg %p2059_p4 }
 0x232   : > { %p2066_p2 = por %p2065_p7, %p2064_p5 }
 0x234   : > { %p2067_p6 = pnand %p2066_p2, %p2060_p9 }
 0x236   : > { %2070 = shalt.err (!%p2067_p6)
}
 0x237   : > { %s2213_s6 = smov 128   ;;  %s2214_s19 = smov 8  }
 0x238   : > { %1763 = dma.vmem_to_hbm [thread:$0]  (%p3394_p11), %s3201_s2, 2048, %s3207_s20, %s1351_s15, %s2213_s6, %s2213_s6, %s2214_s19  }
 0x239 PF: > { %s3395_s24 = sld [smem:[#allocation17_spill]]  ;;  %s3396_s5 = sld [smem:[#allocation25_spill]] }
 0x23a   : > { %p1786_p0 = scmp.ge.s32.totalorder %s2201_s14, 2 }
 0x23f   : > { %s1383_s13 = sand.u32 1, %s3395_s24   ;;  %p3397_p10 = scmp.ne.s32.totalorder %s3396_s5, 0 }
 0x240   : > { %s1384_s7 = scalar_lea.sflag [#allocation5], %s1383_s13 }
 0x241   : > { %p1780_p12 = pnand %p1786_p0, %p3397_p10 }
 0x243   : > { %2144 = dma.done.wait (!%p1780_p12), %s1384_s7, 2048  }
 0x244   : > { %2146 = vsyncadd (!%p1780_p12), %s1384_s7, 4294965248  ;;  %s27_s14 = sadd.s32 1, %s2201_s14   ;;  %s3399_s27 = sld [smem:[#allocation18_spill]] }
 0x245   : > { %p3240_p8 = scmp.ge.s32.totalorder %s27_s14, 6   ;;  %s3400_s30 = sld [smem:[#allocation19_spill]] }
 0x246   : > { %s3401_s1 = sld [smem:[#allocation30_spill]]  ;;  %s3402_s2 = sld [smem:[#allocation22_spill]] }
 0x247   : > { %s3403_s11 = sld [smem:[#allocation23_spill]]  ;;  %s3404_s12 = sld [smem:[#allocation24_spill]] }
 0x248   : > { %s3405_s13 = sld [smem:[#allocation28_spill]]  ;;  %s3406_s24 = smov %s2153_s25 }
 0x249   : > { %s3407_s25 = smov %s2157_s26  ;;  %s3408_s26 = smov %s2583_s28 }
 0x24a   : > { %s3409_s28 = smov %s2169_s29  ;;  %s3410_s29 = smov %s2507_s10 }
 0x24b   : > { %s3411_s8 = smov %s2181_s9  ;;  %26 = sbr.rel (!%p3240_p8) target bundleno = 21 (0x15), region = 133 }
 0x24c   : > { %s3412_s9 = smov %s3401_s1  ;;  %s3413_s10 = smov %s3402_s2 }
 0x252   :  { %1389 = vsyncpa [#allocation4], 1 }
 0x253   :  { %1391 = vsyncpa [#allocation4 + $0x1], 1 }
 0x254   :  { %1392 = vsyncpa [#allocation7], 1 }
 0x255   :  { %1394 = vsyncpa [#allocation7 + $0x1], 1 }
 0x256   :  { %1395 = vsyncpa [#allocation10], 1 }
 0x257   :  { %1396 = vsyncpa [#allocation5], 1 }
 0x258   :  { %1398 = vsyncpa [#allocation5 + $0x1], 1 }

</bundles_post_ra>
